<compile_context>
chip_gen: v5e
topology: v5e:2x2
jax: 0.10.0
libtpu: 0.0.40
codegen_flags: <defaults>
</compile_context>

<pallas_src>
import jax
import jax.numpy as jnp
from jax import lax
from jax.experimental import pallas as pl
from jax.experimental.pallas import tpu as pltpu

# ----------------------------- configuration --------------------------------
N, CIN, D = 2, 8, 8          # batch, in_channel, depth (small synthetic sizes)
H = W = 16                   # spatial
PAD = 12                     # halo: max surviving tap offset after d=18 skipping
HP = H + 2 * PAD             # 40
WP = W + 2 * PAD             # 40
WPC = WP * CIN               # 320  lane width of one padded-row window
WD = W * D                   # 128  lane width of one output row (full vreg line)
OY = (-12, -6, 0, 6, 12)     # distinct vertical tap offsets after d=18 skipping
ROW0 = tuple(PAD + oy for oy in OY)          # (0, 6, 12, 18, 24)
NG = len(OY)
KRAW = NG * WPC                              # 1600
KPAD = ((KRAW + 127) // 128) * 128           # 1664 (lane-tile aligned K)
NH = N * H                                   # 32 stacked output rows

# These two invariants make the dead-tap skipping / halo size exact; fail loudly
# if someone reuses this at larger spatial sizes.
assert H <= 18 and W <= 18, "d=18 off-center-tap skipping only exact for H,W<=18"
assert PAD >= max(abs(o) for o in OY), "halo smaller than max surviving dilation"


# ------------------------------ Pallas kernel --------------------------------
def aspp_kernel(lhs_ref,     # (NH, KPAD)      bf16 stacked shifted-row windows
                w_ref,       # (KPAD, 2*WD)    bf16 fused conv+pool weight
                bias_ref,    # (1, WD)         f32 folded bias (tiled along W)
                o_ref):      # (N, H, WD)      f32 lane-dense output
    # Single MXU matmul covering all branches, all taps, both samples.
    y = jnp.dot(lhs_ref[...], w_ref[...],
                preferred_element_type=jnp.float32)          # (NH, 2*WD)
    conv = y[:, :WD].reshape(N, H, WD)                       # fused atrous/1x1 stack
    pool = y[:, WD:].reshape(N, H, WD)                       # per-row pool partials
    pool_sum = jnp.sum(pool, axis=1, keepdims=True)          # (N, 1, WD) exact GAP
    o_ref[...] = (conv + pool_sum + bias_ref[...]).astype(o_ref.dtype)


# ------------------------- wrapper-side weight folding ------------------------
def fold_params(params):
    """Fold the final 1x1 conv (wo, bo) into every branch weight and build one
    K-stacked, block-structured matmul weight of shape (KPAD, 2*WD):
      columns [:WD]  -> fused atrous/1x1 conv stack (5 row-offset groups on K)
      columns [WD:]  -> global-average-pool branch, attached to the oy=0 group.
    Pure layout/param preprocessing (XLA side)."""
    wo = params["wo"]                                   # (5, D, D): [img, a1, a6, a12, a18]

    w1f = params["w1"] @ wo[1]                                        # (CIN, D)
    w6f = jnp.einsum("yxcd,de->yxce", params["w6"], wo[2])            # (3,3,CIN,D)
    w12f = jnp.einsum("yxcd,de->yxce", params["w12"], wo[3])
    w18f = jnp.einsum("yxcd,de->yxce", params["w18"], wo[4])
    w_imgf = params["w_img"] @ wo[0]                                  # (CIN, D)

    bias = (params["bo"]
            + params["b_img"] @ wo[0]
            + params["b1"] @ wo[1]
            + params["b6"] @ wo[2]
            + params["b12"] @ wo[3]
            + params["b18"] @ wo[4])                                  # (1, D)
    bias_tiled = jnp.tile(bias, (1, W))                               # (1, W*D)

    # Merged center tap (1x1 branch + center taps of all dilated branches);
    # d=18 off-center taps only see zero padding at H=W=16 -> dropped exactly.
    w_center = w1f + w6f[1, 1] + w12f[1, 1] + w18f[1, 1]              # (CIN, D)

    taps = [(0, 0, w_center)]
    for dil, wf in ((6, w6f), (12, w12f)):
        for ky in range(3):
            for kx in range(3):
                if ky == 1 and kx == 1:
                    continue
                taps.append(((ky - 1) * dil, (kx - 1) * dil, wf[ky, kx]))
    # 1 + 8 + 8 = 17 surviving taps.

    cols = jnp.arange(WP)    # padded column index p
    outs = jnp.arange(W)     # output column index w

    def tap_block(ox, w_eff):
        # place[w, p] = 1  iff  p == PAD + ox + w
        place = (cols[None, :] == outs[:, None] + PAD + ox).astype(jnp.float32)
        blk = jnp.einsum("wp,cd->pcwd", place, w_eff)                 # (WP,CIN,W,D)
        return blk.reshape(WPC, WD)

    groups = {oy: jnp.zeros((WPC, WD), jnp.float32) for oy in OY}
    for oy, ox, w_eff in taps:
        groups[oy] = groups[oy] + tap_block(ox, w_eff)

    # Pool weight: wpool[p*CIN+c, w*D+d] = in_window(p) * w_imgf[c, d] / (H*W)
    in_win = ((cols >= PAD) & (cols < PAD + W)).astype(jnp.float32)   # (WP,)
    wpool = jnp.einsum("p,cd,w->pcwd", in_win, w_imgf / float(H * W),
                       jnp.ones((W,), jnp.float32)).reshape(WPC, WD)

    # Assemble the single fused weight (zero rows pad K up to KPAD).
    wfull = jnp.zeros((KPAD, 2 * WD), jnp.float32)
    for g, oy in enumerate(OY):
        wfull = wfull.at[g * WPC:(g + 1) * WPC, :WD].set(groups[oy])
    g0 = OY.index(0)                                                  # oy == 0 group
    wfull = wfull.at[g0 * WPC:(g0 + 1) * WPC, WD:].set(wpool)
    return wfull, bias_tiled


# ------------------------------ wrapper --------------------------------------
def aspp_pallas(x_nhwc, params):
    wfused, bias = fold_params(params)

    # Shared zero pad (halo 12) + lane-dense flatten (Wp*CIN on the lane axis).
    xp = jnp.pad(x_nhwc, ((0, 0), (PAD, PAD), (PAD, PAD), (0, 0)))
    xp = xp.reshape(N, HP, WPC)

    # Pre-materialized, tile-aligned shifted row windows, stacked along K, then
    # both samples stacked along the sublane (M) axis: (N*H, KPAD).
    lhs = jnp.concatenate([xp[:, r0:r0 + H, :] for r0 in ROW0], axis=-1)
    lhs = lhs.reshape(NH, KRAW)
    lhs = jnp.pad(lhs, ((0, 0), (0, KPAD - KRAW)))

    # bf16 operands, f32 accumulation inside the kernel.
    lhs = lhs.astype(jnp.bfloat16)
    wfused = wfused.astype(jnp.bfloat16)

    out = pl.pallas_call(
        aspp_kernel,
        out_shape=jax.ShapeDtypeStruct((N, H, WD), jnp.float32),
        grid=(1,),
        in_specs=[
            pl.BlockSpec((NH, KPAD), lambda i: (0, 0)),           # stacked LHS
            pl.BlockSpec((KPAD, 2 * WD), lambda i: (0, 0)),       # fused weight
            pl.BlockSpec((1, WD), lambda i: (0, 0)),              # folded bias
        ],
        out_specs=pl.BlockSpec((N, H, WD), lambda i: (0, 0, 0)),
        compiler_params=pltpu.CompilerParams(
            dimension_semantics=("arbitrary",)),
    )(lhs, wfused, bias)

    return out.reshape(N, H, W, D)                                    # NHWC


# ------------------------------ pure-JAX reference ---------------------------
def aspp_ref(x_nhwc, params):
    dn = lax.conv_dimension_numbers(x_nhwc.shape, (1, 1, CIN, D),
                                    ("NHWC", "HWIO", "NHWC"))

    def conv1x1(x, w, b):
        return lax.conv_general_dilated(
            x, w.reshape(1, 1, w.shape[0], w.shape[1]),
            window_strides=(1, 1), padding="VALID",
            dimension_numbers=dn) + b.reshape(1, 1, 1, -1)

    def conv3x3_dil(x, w, b, d):
        return lax.conv_general_dilated(
            x, w, window_strides=(1, 1),
            padding=[(d, d), (d, d)], rhs_dilation=(d, d),
            dimension_numbers=dn) + b.reshape(1, 1, 1, -1)

    pooled = jnp.mean(x_nhwc, axis=(1, 2), keepdims=True)             # (N,1,1,CIN)
    img = conv1x1(pooled, params["w_img"], params["b_img"])           # (N,1,1,D)
    img = jnp.broadcast_to(img, (N, H, W, D))                         # bilinear from 1x1
    a1 = conv1x1(x_nhwc, params["w1"], params["b1"])
    a6 = conv3x3_dil(x_nhwc, params["w6"], params["b6"], 6)
    a12 = conv3x3_dil(x_nhwc, params["w12"], params["b12"], 12)
    a18 = conv3x3_dil(x_nhwc, params["w18"], params["b18"], 18)
    cat = jnp.concatenate([img, a1, a6, a12, a18], axis=-1)           # (N,H,W,5D)
    wo_flat = params["wo"].reshape(5 * D, D)                          # (5D, D)
    return conv1x1(cat, wo_flat, params["bo"])


# ------------------------------ main ------------------------------------------
if __name__ == "__main__":
    key = jax.random.PRNGKey(0)
    keys = jax.random.split(key, 14)

    def rn(k, shape, scale=0.1):
        return (scale * jax.random.normal(k, shape)).astype(jnp.float32)

    params = {
        "w_img": rn(keys[0], (CIN, D)), "b_img": rn(keys[1], (1, D)),
        "w1":    rn(keys[2], (CIN, D)), "b1":    rn(keys[3], (1, D)),
        "w6":    rn(keys[4], (3, 3, CIN, D)), "b6":  rn(keys[5], (1, D)),
        "w12":   rn(keys[6], (3, 3, CIN, D)), "b12": rn(keys[7], (1, D)),
        "w18":   rn(keys[8], (3, 3, CIN, D)), "b18": rn(keys[9], (1, D)),
        "wo":    rn(keys[10], (5, D, D)),     "bo":  rn(keys[11], (1, D)),
    }

    # PyTorch-convention input is NCHW; kernel layout is NHWC.
    x_nchw = rn(keys[12], (N, CIN, H, W), scale=1.0)
    x_nhwc = jnp.transpose(x_nchw, (0, 2, 3, 1))

    fwd = jax.jit(aspp_pallas)
    out = fwd(x_nhwc, params)
    out = jax.block_until_ready(out)

    ref = aspp_ref(x_nhwc, params)
    assert out.shape == (N, H, W, D)
    # bf16 operands (f32 accumulation) -> loosened tolerance vs. the f32 reference.
    assert jnp.allclose(out, ref, atol=2e-2, rtol=2e-2), (
        float(jnp.max(jnp.abs(out - ref))))

    print("KERNEL_OK")
</pallas_src>

<mosaic_0001>
module attributes {stable_mosaic.version = 11 : i64} {
  func.func @aspp_kernel(%arg0: i32, %arg1: memref<32x1664xbf16, #tpu.memory_space<vmem>>, %arg2: memref<1664x256xbf16, #tpu.memory_space<vmem>>, %arg3: memref<1x128xf32, #tpu.memory_space<vmem>>, %arg4: memref<2x16x128xf32, #tpu.memory_space<vmem>>) attributes {dimension_semantics = [#tpu.dimension_semantics<arbitrary>], iteration_bounds = array<i64: 1>, scalar_prefetch = 0 : i64, scratch_operands = 0 : i64, tpu.core_type = #tpu.core_type<tc>, window_params = [{pipeline_mode = #tpu.pipeline_mode<synchronous>, transform_indices = @transform_0, window_bounds = array<i64: 32, 1664>}, {pipeline_mode = #tpu.pipeline_mode<synchronous>, transform_indices = @transform_1, window_bounds = array<i64: 1664, 256>}, {pipeline_mode = #tpu.pipeline_mode<synchronous>, transform_indices = @transform_2, window_bounds = array<i64: 1, 128>}, {pipeline_mode = #tpu.pipeline_mode<synchronous>, transform_indices = @transform_3, window_bounds = array<i64: 2, 16, 128>}]} {
    %c0 = arith.constant 0 : index
    %c0_0 = arith.constant 0 : index
    %0 = vector.load %arg1[%c0, %c0_0] : memref<32x1664xbf16, #tpu.memory_space<vmem>>, vector<32x1664xbf16>
    %c0_1 = arith.constant 0 : index
    %c0_2 = arith.constant 0 : index
    %1 = vector.load %arg2[%c0_1, %c0_2] : memref<1664x256xbf16, #tpu.memory_space<vmem>>, vector<1664x256xbf16>
    %cst = arith.constant dense<0.000000e+00> : vector<32x256xf32>
    %2 = tpu.matmul %0, %1, %cst {dimension_numbers = #tpu.dot_dimension_numbers<[1], [0], [0], [1], [0, 0, 1, 1], [], []>} : vector<32x1664xbf16>, vector<1664x256xbf16>, vector<32x256xf32> -> vector<32x256xf32>
    %3 = vector.extract_strided_slice %2 {offsets = [0, 0], sizes = [32, 128], strides = [1, 1]} : vector<32x256xf32> to vector<32x128xf32>
    %4 = vector.shape_cast %3 : vector<32x128xf32> to vector<2x16x128xf32>
    %5 = vector.extract_strided_slice %2 {offsets = [0, 128], sizes = [32, 128], strides = [1, 1]} : vector<32x256xf32> to vector<32x128xf32>
    %6 = vector.shape_cast %5 : vector<32x128xf32> to vector<2x16x128xf32>
    %cst_3 = arith.constant dense<0.000000e+00> : vector<2x128xf32>
    %7 = vector.multi_reduction <add>, %6, %cst_3 [1] : vector<2x16x128xf32> to vector<2x128xf32>
    %8 = vector.shape_cast %7 : vector<2x128xf32> to vector<2x1x128xf32>
    %9 = vector.broadcast %8 : vector<2x1x128xf32> to vector<2x16x128xf32>
    %10 = arith.addf %4, %9 : vector<2x16x128xf32>
    %c0_4 = arith.constant 0 : index
    %c0_5 = arith.constant 0 : index
    %11 = vector.load %arg3[%c0_4, %c0_5] : memref<1x128xf32, #tpu.memory_space<vmem>>, vector<1x128xf32>
    %12 = vector.shape_cast %11 : vector<1x128xf32> to vector<1x1x128xf32>
    %13 = vector.broadcast %12 : vector<1x1x128xf32> to vector<2x16x128xf32>
    %14 = arith.addf %10, %13 : vector<2x16x128xf32>
    %c0_6 = arith.constant 0 : index
    %c0_7 = arith.constant 0 : index
    %c0_8 = arith.constant 0 : index
    %15 = vector.load %arg4[%c0_6, %c0_7, %c0_8] : memref<2x16x128xf32, #tpu.memory_space<vmem>>, vector<2x16x128xf32>
    tpu.vector_store %arg4[%c0_6, %c0_7, %c0_8], %14 {strides = array<i32>} : memref<2x16x128xf32, #tpu.memory_space<vmem>>, vector<2x16x128xf32>,
    return
  }
  func.func @transform_0(%arg0: i32) -> (i32, i32) {
    %c0_i32 = arith.constant 0 : i32
    %c0_i32_0 = arith.constant 0 : i32
    %c0_i32_1 = arith.constant 0 : i32
    return %c0_i32, %c0_i32_0 : i32, i32
  }
  func.func @transform_1(%arg0: i32) -> (i32, i32) {
    %c0_i32 = arith.constant 0 : i32
    %c0_i32_0 = arith.constant 0 : i32
    %c0_i32_1 = arith.constant 0 : i32
    return %c0_i32, %c0_i32_0 : i32, i32
  }
  func.func @transform_2(%arg0: i32) -> (i32, i32) {
    %c0_i32 = arith.constant 0 : i32
    %c0_i32_0 = arith.constant 0 : i32
    %c0_i32_1 = arith.constant 0 : i32
    return %c0_i32, %c0_i32_0 : i32, i32
  }
  func.func @transform_3(%arg0: i32) -> (i32, i32, i32) {
    %c0_i32 = arith.constant 0 : i32
    %c0_i32_0 = arith.constant 0 : i32
    %c0_i32_1 = arith.constant 0 : i32
    %c0_i32_2 = arith.constant 0 : i32
    return %c0_i32, %c0_i32_0, %c0_i32_1 : i32, i32, i32
  }
}

</mosaic_0001>

<bundles_post_ra>
// kernel: aspp_pallas.1
= control target key start
LH: loop header
LB: loop body
LE: loop exit
PB: predicated region body
PF: predicated region fallthrough
CT: control target
= control target key end

     0   :  { %s4707_s1 = inlined_call_operand.vmem [shape: bf16[1664,256], index: 1, kind: input, shape index: {}]   ;;  %s4708_s0 = inlined_call_operand.vmem [shape: bf16[32,1664], index: 0, kind: input, shape index: {}]   ;;  %s4709_s2 = inlined_call_operand.vmem [shape: f32[1,128], index: 2, kind: input, shape index: {}]   ;;  %s4710_s3 = inlined_call_operand.vmem [shape: f32[2,16,128], index: 3, kind: output, shape index: {}]  }
   0x1   :  { %v2112_v0 = vld [vmem:[%s4707_s1 + $0x70] sm:$0xf]  ;;  %v2927_v1 = vld [vmem:[%s4707_s1 + $0x74] sm:$0xf0]  ;;  %v2104_v11 = vld [vmem:[%s4707_s1 + $0x60] sm:$0xf] }
   0x2   :  { %v2176_v2 = vld [vmem:[%s4707_s1 + $0xf0] sm:$0xf]  ;;  %v2113_v3 = vor.u32 %v2927_v1, %v2112_v0  ;;  %v2943_v4 = vld [vmem:[%s4707_s1 + $0xf4] sm:$0xf0]  ;;  %v2925_v13 = vld [vmem:[%s4707_s1 + $0x64] sm:$0xf0] }
   0x3   :  { %v2240_v5 = vld [vmem:[%s4707_s1 + $0x170] sm:$0xf]  ;;  %v2959_v6 = vld [vmem:[%s4707_s1 + $0x174] sm:$0xf0]  ;;  %v2177_v7 = vor.u32 %v2943_v4, %v2176_v2  ;;  %v2168_v14 = vld [vmem:[%s4707_s1 + $0xe0] sm:$0xf]  ;;  %v2105_v16 = vor.u32 %v2925_v13, %v2104_v11 }
   0x4   :  { %v2241_v8 = vor.u32 %v2959_v6, %v2240_v5  ;;  %v2304_v9 = vld [vmem:[%s4707_s1 + $0x1f0] sm:$0xf]  ;;  %v2975_v10 = vld [vmem:[%s4707_s1 + $0x1f4] sm:$0xf0]  ;;  %1422 = vmatpush.bf16.msra.mxu0 %v2113_v3  ;;  %v2941_v15 = vld [vmem:[%s4707_s1 + $0xe4] sm:$0xf0] }
   0x5   :  { %v2305_v12 = vor.u32 %v2975_v10, %v2304_v9  ;;  %1441 = vmatpush.bf16.msra.mxu1 %v2177_v7  ;;  %v2169_v17 = vor.u32 %v2941_v15, %v2168_v14  ;;  %v2232_v18 = vld [vmem:[%s4707_s1 + $0x160] sm:$0xf]  ;;  %v2957_v19 = vld [vmem:[%s4707_s1 + $0x164] sm:$0xf0]  ;;  %v2096_v23 = vld [vmem:[%s4707_s1 + $0x50] sm:$0xf] }
   0x6   :  { %1460 = vmatpush.bf16.msra.mxu2 %v2241_v8  ;;  %v2296_v20 = vld [vmem:[%s4707_s1 + $0x1e0] sm:$0xf]  ;;  %v2233_v21 = vor.u32 %v2957_v19, %v2232_v18  ;;  %v2973_v22 = vld [vmem:[%s4707_s1 + $0x1e4] sm:$0xf0]  ;;  %v2923_v24 = vld [vmem:[%s4707_s1 + $0x54] sm:$0xf0] }
   0x7   :  { %1479 = vmatpush.bf16.msra.mxu3 %v2305_v12  ;;  %v2297_v25 = vor.u32 %v2973_v22, %v2296_v20  ;;  %v2160_v26 = vld [vmem:[%s4707_s1 + $0xd0] sm:$0xf]  ;;  %v2939_v27 = vld [vmem:[%s4707_s1 + $0xd4] sm:$0xf0]  ;;  %v2097_v29 = vor.u32 %v2923_v24, %v2096_v23  ;;  %v2088_v35 = vld [vmem:[%s4707_s1 + $0x40] sm:$0xf] }
   0x8   :  { %v2224_v28 = vld [vmem:[%s4707_s1 + $0x150] sm:$0xf]  ;;  %1423 = vmatpush.bf16.msra.mxu0 %v2105_v16  ;;  %v2955_v30 = vld [vmem:[%s4707_s1 + $0x154] sm:$0xf0]  ;;  %v2161_v33 = vor.u32 %v2939_v27, %v2160_v26  ;;  %v2921_v36 = vld [vmem:[%s4707_s1 + $0x44] sm:$0xf0] }
   0x9   :  { %v2288_v31 = vld [vmem:[%s4707_s1 + $0x1d0] sm:$0xf]  ;;  %v2971_v32 = vld [vmem:[%s4707_s1 + $0x1d4] sm:$0xf0]  ;;  %1442 = vmatpush.bf16.msra.mxu1 %v2169_v17  ;;  %v2225_v34 = vor.u32 %v2955_v30, %v2224_v28  ;;  %v2152_v37 = vld [vmem:[%s4707_s1 + $0xc0] sm:$0xf]  ;;  %v2089_v44 = vor.u32 %v2921_v36, %v2088_v35 }
   0xa   :  { %1461 = vmatpush.bf16.msra.mxu2 %v2233_v21  ;;  %v2289_v38 = vor.u32 %v2971_v32, %v2288_v31  ;;  %v2937_v39 = vld [vmem:[%s4707_s1 + $0xc4] sm:$0xf0]  ;;  %v2216_v40 = vld [vmem:[%s4707_s1 + $0x140] sm:$0xf]  ;;  %v2080_v47 = vld [vmem:[%s4707_s1 + $0x30] sm:$0xf] }
   0xb   :  { %1480 = vmatpush.bf16.msra.mxu3 %v2297_v25  ;;  %v2953_v41 = vld [vmem:[%s4707_s1 + $0x144] sm:$0xf0]  ;;  %v2280_v42 = vld [vmem:[%s4707_s1 + $0x1c0] sm:$0xf]  ;;  %v2153_v45 = vor.u32 %v2937_v39, %v2152_v37  ;;  %v2919_v48 = vld [vmem:[%s4707_s1 + $0x34] sm:$0xf0] }
   0xc   :  { %v2969_v43 = vld [vmem:[%s4707_s1 + $0x1c4] sm:$0xf0]  ;;  %1424 = vmatpush.bf16.msra.mxu0 %v2097_v29  ;;  %v2217_v46 = vor.u32 %v2953_v41, %v2216_v40  ;;  %v2144_v49 = vld [vmem:[%s4707_s1 + $0xb0] sm:$0xf]  ;;  %v2935_v51 = vld [vmem:[%s4707_s1 + $0xb4] sm:$0xf0]  ;;  %v2081_v56 = vor.u32 %v2919_v48, %v2080_v47 }
   0xd   :  { %1443 = vmatpush.bf16.msra.mxu1 %v2161_v33  ;;  %v2281_v50 = vor.u32 %v2969_v43, %v2280_v42  ;;  %v2208_v52 = vld [vmem:[%s4707_s1 + $0x130] sm:$0xf]  ;;  %v2951_v53 = vld [vmem:[%s4707_s1 + $0x134] sm:$0xf0]  ;;  %v2145_v57 = vor.u32 %v2935_v51, %v2144_v49  ;;  %v2072_v59 = vld [vmem:[%s4707_s1 + $0x20] sm:$0xf] }
   0xe   :  { %1462 = vmatpush.bf16.msra.mxu2 %v2225_v34  ;;  %v2272_v54 = vld [vmem:[%s4707_s1 + $0x1b0] sm:$0xf]  ;;  %v2967_v55 = vld [vmem:[%s4707_s1 + $0x1b4] sm:$0xf0]  ;;  %v2209_v58 = vor.u32 %v2951_v53, %v2208_v52  ;;  %v2917_v60 = vld [vmem:[%s4707_s1 + $0x24] sm:$0xf0] }
   0xf   :  { %1481 = vmatpush.bf16.msra.mxu3 %v2289_v38  ;;  %v2136_v61 = vld [vmem:[%s4707_s1 + $0xa0] sm:$0xf]  ;;  %v2273_v62 = vor.u32 %v2967_v55, %v2272_v54  ;;  %v2933_v63 = vld [vmem:[%s4707_s1 + $0xa4] sm:$0xf0]  ;;  %v2073_v4 = vor.u32 %v2917_v60, %v2072_v59  ;;  %v2064_v7 = vld [vmem:[%s4707_s1 + $0x10] sm:$0xf] }
  0x10   :  { %1425 = vmatpush.bf16.msra.mxu0 %v2089_v44  ;;  %v2200_v0 = vld [vmem:[%s4707_s1 + $0x120] sm:$0xf]  ;;  %v2949_v1 = vld [vmem:[%s4707_s1 + $0x124] sm:$0xf0]  ;;  %v2137_v5 = vor.u32 %v2933_v63, %v2136_v61  ;;  %v2915_v8 = vld [vmem:[%s4707_s1 + $0x14] sm:$0xf0] }
  0x11   :  { %1444 = vmatpush.bf16.msra.mxu1 %v2153_v45  ;;  %v2264_v2 = vld [vmem:[%s4707_s1 + $0x1a0] sm:$0xf]  ;;  %v2965_v3 = vld [vmem:[%s4707_s1 + $0x1a4] sm:$0xf0]  ;;  %v2201_v6 = vor.u32 %v2949_v1, %v2200_v0  ;;  %v2128_v9 = vld [vmem:[%s4707_s1 + $0x90] sm:$0xf]  ;;  %v2065_v17 = vor.u32 %v2915_v8, %v2064_v7 }
  0x12   :  { %1463 = vmatpush.bf16.msra.mxu2 %v2217_v46  ;;  %v2265_v10 = vor.u32 %v2965_v3, %v2264_v2  ;;  %v2931_v11 = vld [vmem:[%s4707_s1 + $0x94] sm:$0xf0]  ;;  %v2192_v12 = vld [vmem:[%s4707_s1 + $0x110] sm:$0xf]  ;;  %v2056_v16 = vld [vmem:[%s4707_s1] sm:$0xf] }
  0x13   :  { %1482 = vmatpush.bf16.msra.mxu3 %v2281_v50  ;;  %v2947_v13 = vld [vmem:[%s4707_s1 + $0x114] sm:$0xf0]  ;;  %v2256_v14 = vld [vmem:[%s4707_s1 + $0x190] sm:$0xf]  ;;  %v2913_v18 = vld [vmem:[%s4707_s1 + $0x4] sm:$0xf0]  ;;  %v2129_v21 = vor.u32 %v2931_v11, %v2128_v9 }
  0x14   :  { %1426 = vmatpush.bf16.msra.mxu0 %v2081_v56  ;;  %v2963_v15 = vld [vmem:[%s4707_s1 + $0x194] sm:$0xf0]  ;;  %v2120_v19 = vld [vmem:[%s4707_s1 + $0x80] sm:$0xf]  ;;  %v2929_v20 = vld [vmem:[%s4707_s1 + $0x84] sm:$0xf0]  ;;  %v2193_v22 = vor.u32 %v2947_v13, %v2192_v12  ;;  %v2057_v34 = vor.u32 %v2913_v18, %v2056_v16 }
  0x15   :  { %1445 = vmatpush.bf16.msra.mxu1 %v2145_v57  ;;  %v2184_v23 = vld [vmem:[%s4707_s1 + $0x100] sm:$0xf]  ;;  %v2945_v24 = vld [vmem:[%s4707_s1 + $0x104] sm:$0xf0]  ;;  %v2257_v26 = vor.u32 %v2963_v15, %v2256_v14  ;;  %v2892_v29 = vld [vmem:[%s4708_s0 + $0x30] sm:$0xf0]  ;;  %v2121_v38 = vor.u32 %v2929_v20, %v2120_v19 }
  0x16   :  { %1464 = vmatpush.bf16.msra.mxu2 %v2209_v58  ;;  %v2248_v25 = vld [vmem:[%s4707_s1 + $0x180] sm:$0xf]  ;;  %v2961_v27 = vld [vmem:[%s4707_s1 + $0x184] sm:$0xf0]  ;;  %v2886_v30 = vld [vmem:[%s4708_s0 + $0x4] sm:$0xf]  ;;  %v2185_v39 = vor.u32 %v2945_v24, %v2184_v23 }
  0x17   :  { %1483 = vmatpush.bf16.msra.mxu3 %v2273_v62  ;;  %v1952_v28 = vld [vmem:[%s4708_s0] sm:$0xf]  ;;  %v1954_v31 = vld [vmem:[%s4708_s0 + $0x34] sm:$0xf0]  ;;  %v2496_v32 = vld [vmem:[%s4707_s1 + $0x370] sm:$0xf]  ;;  %v2249_v43 = vor.u32 %v2961_v27, %v2248_v25 }
  0x18   :  { %1427 = vmatpush.bf16.msra.mxu0 %v2073_v4  ;;  %v3023_v33 = vld [vmem:[%s4707_s1 + $0x374] sm:$0xf0]  ;;  %v1960_v35 = vld [vmem:[%s4708_s0 + $0x8] sm:$0xf]  ;;  %v2432_v36 = vld [vmem:[%s4707_s1 + $0x2f0] sm:$0xf]  ;;  %v3394_v48 = vor.u32 %v2892_v29, %v1952_v28  ;;  %v3405_v53 = vor.u32 %v2886_v30, %v1954_v31 }
  0x19   :  { %1446 = vmatpush.bf16.msra.mxu1 %v2137_v5  ;;  %v3007_v37 = vld [vmem:[%s4707_s1 + $0x2f4] sm:$0xf0]  ;;  %v2893_v40 = vld [vmem:[%s4708_s0 + $0x38] sm:$0xf0]  ;;  %v2887_v41 = vld [vmem:[%s4708_s0 + $0xc] sm:$0xf]  ;;  %v2497_v44 = vor.u32 %v3023_v33, %v2496_v32 }
  0x1a   :  { %1465 = vmatpush.bf16.msra.mxu2 %v2201_v6  ;;  %v1962_v42 = vld [vmem:[%s4708_s0 + $0x3c] sm:$0xf0]  ;;  %v2368_v45 = vld [vmem:[%s4707_s1 + $0x270] sm:$0xf]  ;;  %v2991_v46 = vld [vmem:[%s4707_s1 + $0x274] sm:$0xf0]  ;;  %v2433_v49 = vor.u32 %v3007_v37, %v2432_v36  ;;  %v3407_v54 = vor.u32 %v2893_v40, %v1960_v35 }
  0x1b   :  { %1484 = vmatpush.bf16.msra.mxu3 %v2265_v10  ;;  %v2560_v47 = vld [vmem:[%s4707_s1 + $0x3f0] sm:$0xf]  ;;  %v3039_v50 = vld [vmem:[%s4707_s1 + $0x3f4] sm:$0xf0]  ;;  %v2488_v51 = vld [vmem:[%s4707_s1 + $0x360] sm:$0xf]  ;;  %v3415_v57 = vor.u32 %v2887_v41, %v1962_v42  ;;  %v2369_v58 = vor.u32 %v2991_v46, %v2368_v45 }
  0x1c   :  { %1428 = vmatpush.bf16.msra.mxu0 %v2065_v17  ;;  %v3021_v52 = vld [vmem:[%s4707_s1 + $0x364] sm:$0xf0]  ;;  %v2424_v55 = vld [vmem:[%s4707_s1 + $0x2e0] sm:$0xf]  ;;  %v2561_v59 = vor.u32 %v3039_v50, %v2560_v47  ;;  %v2480_v2 = vld [vmem:[%s4707_s1 + $0x350] sm:$0xf] }
  0x1d   :  { %1447 = vmatpush.bf16.msra.mxu1 %v2129_v21  ;;  %v3005_v56 = vld [vmem:[%s4707_s1 + $0x2e4] sm:$0xf0]  ;;  %v2489_v60 = vor.u32 %v3021_v52, %v2488_v51  ;;  %v2360_v61 = vld [vmem:[%s4707_s1 + $0x260] sm:$0xf]  ;;  %v3019_v3 = vld [vmem:[%s4707_s1 + $0x354] sm:$0xf0] }
  0x1e   :  { %1466 = vmatpush.bf16.msra.mxu2 %v2193_v22  ;;  %v2989_v62 = vld [vmem:[%s4707_s1 + $0x264] sm:$0xf0]  ;;  %v2552_v63 = vld [vmem:[%s4707_s1 + $0x3e0] sm:$0xf]  ;;  %v2425_v0 = vor.u32 %v3005_v56, %v2424_v55  ;;  %v2416_v4 = vld [vmem:[%s4707_s1 + $0x2d0] sm:$0xf]  ;;  %v2481_v8 = vor.u32 %v3019_v3, %v2480_v2 }
  0x1f   :  { %1485 = vmatpush.bf16.msra.mxu3 %v2257_v26  ;;  %v3037_v1 = vld [vmem:[%s4707_s1 + $0x3e4] sm:$0xf0]  ;;  %v3003_v5 = vld [vmem:[%s4707_s1 + $0x2d4] sm:$0xf0]  ;;  %v2361_v6 = vor.u32 %v2989_v62, %v2360_v61  ;;  %v2352_v9 = vld [vmem:[%s4707_s1 + $0x250] sm:$0xf] }
  0x20   :  { %1429 = vmatpush.bf16.msra.mxu0 %v2057_v34  ;;  %v2553_v7 = vor.u32 %v3037_v1, %v2552_v63  ;;  %v2987_v10 = vld [vmem:[%s4707_s1 + $0x254] sm:$0xf0]  ;;  %v2544_v11 = vld [vmem:[%s4707_s1 + $0x3d0] sm:$0xf]  ;;  %v2417_v12 = vor.u32 %v3003_v5, %v2416_v4  ;;  %v2472_v14 = vld [vmem:[%s4707_s1 + $0x340] sm:$0xf] }
  0x21   :  { %1448 = vmatpush.bf16.msra.mxu1 %v2121_v38  ;;  %v3035_v13 = vld [vmem:[%s4707_s1 + $0x3d4] sm:$0xf0]  ;;  %v3017_v15 = vld [vmem:[%s4707_s1 + $0x344] sm:$0xf0]  ;;  %v2408_v16 = vld [vmem:[%s4707_s1 + $0x2c0] sm:$0xf]  ;;  %v2353_v18 = vor.u32 %v2987_v10, %v2352_v9 }
  0x22   :  { %1467 = vmatpush.bf16.msra.mxu2 %v2185_v39  ;;  %v3001_v17 = vld [vmem:[%s4707_s1 + $0x2c4] sm:$0xf0]  ;;  %v2344_v19 = vld [vmem:[%s4707_s1 + $0x240] sm:$0xf]  ;;  %v2545_v22 = vor.u32 %v3035_v13, %v2544_v11  ;;  %v2473_v23 = vor.u32 %v3017_v15, %v2472_v14  ;;  %v2905_v26 = vld [vmem:[%s4708_s0 + $0x98] sm:$0xf0] }
  0x23   :  { %1486 = vmatpush.bf16.msra.mxu3 %v2249_v43  ;;  %1430 = vmatmul.bf16.vlgmr.msra.gmra.mxu0 %v3394_v48  ;;  %v2985_v20 = vld [vmem:[%s4707_s1 + $0x244] sm:$0xf0]  ;;  %v2536_v21 = vld [vmem:[%s4707_s1 + $0x3c0] sm:$0xf]  ;;  %v2409_v27 = vor.u32 %v3001_v17, %v2408_v16  ;;  %v2899_v28 = vld [vmem:[%s4708_s0 + $0x6c] sm:$0xf] }
  0x24   :  { %1449 = vmatmul.bf16.vlgmr.msra.gmra.mxu1 %v3405_v53  ;;  %1498 = vmatpush.bf16.msrb.mxu0 %v2369_v58  ;;  %v3033_v24 = vld [vmem:[%s4707_s1 + $0x3c4] sm:$0xf0]  ;;  %v2006_v29 = vld [vmem:[%s4708_s0 + $0x9c] sm:$0xf0]  ;;  %v2464_v30 = vld [vmem:[%s4707_s1 + $0x330] sm:$0xf]  ;;  %v2345_v35 = vor.u32 %v2985_v20, %v2344_v19 }
  0x25   :  { %1517 = vmatpush.bf16.msrb.mxu1 %v2433_v49  ;;  %1468 = vmatmul.bf16.vlgmr.msra.gmra.mxu2 %v3407_v54  ;;  %v2004_v25 = vld [vmem:[%s4708_s0 + $0x68] sm:$0xf]  ;;  %v3015_v31 = vld [vmem:[%s4707_s1 + $0x334] sm:$0xf0]  ;;  %v2012_v32 = vld [vmem:[%s4708_s0 + $0x70] sm:$0xf]  ;;  %v2537_v39 = vor.u32 %v3033_v24, %v2536_v21  ;;  %v3537_v50 = vor.u32 %v2899_v28, %v2006_v29 }
  0x26   :  { %1536 = vmatpush.bf16.msrb.mxu2 %v2497_v44  ;;  %1487 = vmatmul.bf16.vlgmr.msra.gmra.mxu3 %v3415_v57  ;;  %v2400_v33 = vld [vmem:[%s4707_s1 + $0x2b0] sm:$0xf]  ;;  %v2999_v34 = vld [vmem:[%s4707_s1 + $0x2b4] sm:$0xf0]  ;;  %v2906_v36 = vld [vmem:[%s4708_s0 + $0xa0] sm:$0xf0]  ;;  %v2465_v40 = vor.u32 %v3015_v31, %v2464_v30  ;;  %v3526_v44 = vor.u32 %v2905_v26, %v2004_v25 }
  0x27   :  { %1555 = vmatpush.bf16.msrb.mxu3 %v2561_v59  ;;  %v2900_v37 = vld [vmem:[%s4708_s0 + $0x74] sm:$0xf]  ;;  %v2014_v38 = vld [vmem:[%s4708_s0 + $0xa4] sm:$0xf0]  ;;  %v2336_v41 = vld [vmem:[%s4707_s1 + $0x230] sm:$0xf]  ;;  %v2401_v45 = vor.u32 %v2999_v34, %v2400_v33  ;;  %v3539_v51 = vor.u32 %v2906_v36, %v2012_v32 }
  0x28   :  { %1499 = vmatpush.bf16.msrb.mxu0 %v2361_v6  ;;  %v2983_v42 = vld [vmem:[%s4707_s1 + $0x234] sm:$0xf0]  ;;  %v2528_v43 = vld [vmem:[%s4707_s1 + $0x3b0] sm:$0xf]  ;;  %v2456_v47 = vld [vmem:[%s4707_s1 + $0x320] sm:$0xf]  ;;  %v3547_v56 = vor.u32 %v2900_v37, %v2014_v38 }
  0x29   :  { %1518 = vmatpush.bf16.msrb.mxu1 %v2425_v0  ;;  %v3031_v46 = vld [vmem:[%s4707_s1 + $0x3b4] sm:$0xf0]  ;;  %v3013_v49 = vld [vmem:[%s4707_s1 + $0x324] sm:$0xf0]  ;;  %v2392_v52 = vld [vmem:[%s4707_s1 + $0x2a0] sm:$0xf]  ;;  %v2337_v58 = vor.u32 %v2983_v42, %v2336_v41 }
  0x2a   :  { %1537 = vmatpush.bf16.msrb.mxu2 %v2489_v60  ;;  %v2997_v55 = vld [vmem:[%s4707_s1 + $0x2a4] sm:$0xf0]  ;;  %v2529_v59 = vor.u32 %v3031_v46, %v2528_v43  ;;  %v2457_v60 = vor.u32 %v3013_v49, %v2456_v47  ;;  %v2328_v61 = vld [vmem:[%s4707_s1 + $0x220] sm:$0xf]  ;;  %v2448_v2 = vld [vmem:[%s4707_s1 + $0x310] sm:$0xf] }
  0x2b   :  { %1556 = vmatpush.bf16.msrb.mxu3 %v2553_v7  ;;  %v2981_v62 = vld [vmem:[%s4707_s1 + $0x224] sm:$0xf0]  ;;  %v2520_v63 = vld [vmem:[%s4707_s1 + $0x3a0] sm:$0xf]  ;;  %v2393_v0 = vor.u32 %v2997_v55, %v2392_v52  ;;  %v3011_v3 = vld [vmem:[%s4707_s1 + $0x314] sm:$0xf0] }
  0x2c   :  { %1500 = vmatpush.bf16.msrb.mxu0 %v2353_v18  ;;  %v3029_v1 = vld [vmem:[%s4707_s1 + $0x3a4] sm:$0xf0]  ;;  %v2384_v4 = vld [vmem:[%s4707_s1 + $0x290] sm:$0xf]  ;;  %v2995_v5 = vld [vmem:[%s4707_s1 + $0x294] sm:$0xf0]  ;;  %v2329_v6 = vor.u32 %v2981_v62, %v2328_v61  ;;  %v2449_v9 = vor.u32 %v3011_v3, %v2448_v2 }
  0x2d   :  { %1519 = vmatpush.bf16.msrb.mxu1 %v2417_v12  ;;  %v2320_v7 = vld [vmem:[%s4707_s1 + $0x210] sm:$0xf]  ;;  %v2979_v10 = vld [vmem:[%s4707_s1 + $0x214] sm:$0xf0]  ;;  %v2385_v13 = vor.u32 %v2995_v5, %v2384_v4  ;;  %v2440_v14 = vld [vmem:[%s4707_s1 + $0x300] sm:$0xf] }
  0x2e   :  { %1538 = vmatpush.bf16.msrb.mxu2 %v2481_v8  ;;  %v2521_v8 = vor.u32 %v3029_v1, %v2520_v63  ;;  %v2512_v11 = vld [vmem:[%s4707_s1 + $0x390] sm:$0xf]  ;;  %v3027_v12 = vld [vmem:[%s4707_s1 + $0x394] sm:$0xf0]  ;;  %v3009_v15 = vld [vmem:[%s4707_s1 + $0x304] sm:$0xf0]  ;;  %v2321_v20 = vor.u32 %v2979_v10, %v2320_v7 }
  0x2f   :  { %1557 = vmatpush.bf16.msrb.mxu3 %v2545_v22  ;;  %v2376_v16 = vld [vmem:[%s4707_s1 + $0x280] sm:$0xf]  ;;  %v2993_v17 = vld [vmem:[%s4707_s1 + $0x284] sm:$0xf0]  ;;  %v2752_v18 = vld [vmem:[%s4707_s1 + $0x570] sm:$0xf]  ;;  %v2513_v24 = vor.u32 %v3027_v12, %v2512_v11  ;;  %v2441_v25 = vor.u32 %v3009_v15, %v2440_v14 }
  0x30   :  { %1501 = vmatpush.bf16.msrb.mxu0 %v2345_v35  ;;  %v3087_v19 = vld [vmem:[%s4707_s1 + $0x574] sm:$0xf0]  ;;  %v2312_v21 = vld [vmem:[%s4707_s1 + $0x200] sm:$0xf]  ;;  %v2688_v22 = vld [vmem:[%s4707_s1 + $0x4f0] sm:$0xf]  ;;  %v2377_v29 = vor.u32 %v2993_v17, %v2376_v16 }
  0x31   :  { %1520 = vmatpush.bf16.msrb.mxu1 %v2409_v27  ;;  %v2977_v26 = vld [vmem:[%s4707_s1 + $0x204] sm:$0xf0]  ;;  %v2504_v27 = vld [vmem:[%s4707_s1 + $0x380] sm:$0xf]  ;;  %v1968_v30 = vld [vmem:[%s4708_s0 + $0x10] sm:$0xf]  ;;  %v2753_v34 = vor.u32 %v3087_v19, %v2752_v18 }
  0x32   :  { %1539 = vmatpush.bf16.msrb.mxu2 %v2473_v23  ;;  %v3071_v23 = vld [vmem:[%s4707_s1 + $0x4f4] sm:$0xf0]  ;;  %v3025_v28 = vld [vmem:[%s4707_s1 + $0x384] sm:$0xf0]  ;;  %v2894_v31 = vld [vmem:[%s4708_s0 + $0x40] sm:$0xf0]  ;;  %v2313_v42 = vor.u32 %v2977_v26, %v2312_v21 }
  0x33   :  { %1558 = vmatpush.bf16.msrb.mxu3 %v2537_v39  ;;  %1435 = vmatmul.bf16.gmra.mxu0 %v3526_v44  ;;  %v2888_v32 = vld [vmem:[%s4708_s0 + $0x14] sm:$0xf]  ;;  %v1970_v33 = vld [vmem:[%s4708_s0 + $0x44] sm:$0xf0]  ;;  %v2624_v35 = vld [vmem:[%s4707_s1 + $0x470] sm:$0xf]  ;;  %v2689_v38 = vor.u32 %v3071_v23, %v2688_v22  ;;  %v2505_v47 = vor.u32 %v3025_v28, %v2504_v27 }
  0x34   :  { %1454 = vmatmul.bf16.gmra.mxu1 %v3537_v50  ;;  %1502 = vmatpush.bf16.msrb.mxu0 %v2337_v58  ;;  %v3055_v36 = vld [vmem:[%s4707_s1 + $0x474] sm:$0xf0]  ;;  %v2816_v37 = vld [vmem:[%s4707_s1 + $0x5f0] sm:$0xf]  ;;  %v3085_v41 = vld [vmem:[%s4707_s1 + $0x564] sm:$0xf0]  ;;  %v3684_v1 = vor.u32 %v2888_v32, %v1970_v33 }
  0x35   :  { %1521 = vmatpush.bf16.msrb.mxu1 %v2401_v45  ;;  %1473 = vmatmul.bf16.gmra.mxu2 %v3539_v51  ;;  %v3103_v39 = vld [vmem:[%s4707_s1 + $0x5f4] sm:$0xf0]  ;;  %v2895_v45 = vld [vmem:[%s4708_s0 + $0x48] sm:$0xf0]  ;;  %v2889_v46 = vld [vmem:[%s4708_s0 + $0x1c] sm:$0xf]  ;;  %v2625_v52 = vor.u32 %v3055_v36, %v2624_v35 }
  0x36   :  { %1540 = vmatpush.bf16.msrb.mxu2 %v2465_v40  ;;  %1492 = vmatmul.bf16.gmra.mxu3 %v3547_v56  ;;  %v2744_v40 = vld [vmem:[%s4707_s1 + $0x560] sm:$0xf]  ;;  %v1976_v43 = vld [vmem:[%s4708_s0 + $0x18] sm:$0xf]  ;;  %v1978_v49 = vld [vmem:[%s4708_s0 + $0x4c] sm:$0xf0] }
  0x37   :  { %1559 = vmatpush.bf16.msrb.mxu3 %v2529_v59  ;;  %v2616_v55 = vld [vmem:[%s4707_s1 + $0x460] sm:$0xf]  ;;  %v3053_v58 = vld [vmem:[%s4707_s1 + $0x464] sm:$0xf0]  ;;  %v2817_v59 = vor.u32 %v3103_v39, %v2816_v37  ;;  %v2736_v3 = vld [vmem:[%s4707_s1 + $0x550] sm:$0xf]  ;;  %v3695_v5 = vor.u32 %v2895_v45, %v1976_v43 }
  0x38   :  { %1503 = vmatpush.bf16.msrb.mxu0 %v2329_v6  ;;  %v2680_v61 = vld [vmem:[%s4707_s1 + $0x4e0] sm:$0xf]  ;;  %v3069_v62 = vld [vmem:[%s4707_s1 + $0x4e4] sm:$0xf0]  ;;  %v3083_v4 = vld [vmem:[%s4707_s1 + $0x554] sm:$0xf0]  ;;  %v3697_v6 = vor.u32 %v2889_v46, %v1978_v49  ;;  %v2617_v7 = vor.u32 %v3053_v58, %v2616_v55 }
  0x39   :  { %1522 = vmatpush.bf16.msrb.mxu1 %v2393_v0  ;;  %v2808_v63 = vld [vmem:[%s4707_s1 + $0x5e0] sm:$0xf]  ;;  %v3682_v0 = vor.u32 %v2894_v31, %v1968_v30  ;;  %v3101_v2 = vld [vmem:[%s4707_s1 + $0x5e4] sm:$0xf0]  ;;  %v3051_v10 = vld [vmem:[%s4707_s1 + $0x454] sm:$0xf0]  ;;  %v2737_v12 = vor.u32 %v3083_v4, %v2736_v3 }
  0x3a   :  { %1541 = vmatpush.bf16.msrb.mxu2 %v2457_v60  ;;  %v2745_v60 = vor.u32 %v3085_v41, %v2744_v40  ;;  %v2809_v11 = vor.u32 %v3101_v2, %v2808_v63  ;;  %v3067_v14 = vld [vmem:[%s4707_s1 + $0x4d4] sm:$0xf0]  ;;  %v2800_v15 = vld [vmem:[%s4707_s1 + $0x5d0] sm:$0xf]  ;;  %v2728_v17 = vld [vmem:[%s4707_s1 + $0x540] sm:$0xf] }
  0x3b   :  { %1560 = vmatpush.bf16.msrb.mxu3 %v2521_v8  ;;  %v2681_v8 = vor.u32 %v3069_v62, %v2680_v61  ;;  %v3099_v16 = vld [vmem:[%s4707_s1 + $0x5d4] sm:$0xf0]  ;;  %v3081_v18 = vld [vmem:[%s4707_s1 + $0x544] sm:$0xf0]  ;;  %v2600_v21 = vld [vmem:[%s4707_s1 + $0x440] sm:$0xf] }
  0x3c   :  { %1504 = vmatpush.bf16.msrb.mxu0 %v2321_v20  ;;  %v3049_v22 = vld [vmem:[%s4707_s1 + $0x444] sm:$0xf0]  ;;  %v2801_v23 = vor.u32 %v3099_v16, %v2800_v15  ;;  %v2792_v27 = vld [vmem:[%s4707_s1 + $0x5c0] sm:$0xf]  ;;  %v3079_v30 = vld [vmem:[%s4707_s1 + $0x534] sm:$0xf0] }
  0x3d   :  { %1523 = vmatpush.bf16.msrb.mxu1 %v2385_v13  ;;  %v2672_v13 = vld [vmem:[%s4707_s1 + $0x4d0] sm:$0xf]  ;;  %v3065_v26 = vld [vmem:[%s4707_s1 + $0x4c4] sm:$0xf0]  ;;  %v2601_v31 = vor.u32 %v3049_v22, %v2600_v21  ;;  %v2020_v36 = vld [vmem:[%s4708_s0 + $0x78] sm:$0xf] }
  0x3e   :  { %1542 = vmatpush.bf16.msrb.mxu2 %v2449_v9  ;;  %v2608_v9 = vld [vmem:[%s4707_s1 + $0x450] sm:$0xf]  ;;  %v2673_v20 = vor.u32 %v3067_v14, %v2672_v13  ;;  %v3097_v28 = vld [vmem:[%s4707_s1 + $0x5c4] sm:$0xf0]  ;;  %v2907_v37 = vld [vmem:[%s4708_s0 + $0xa8] sm:$0xf0] }
  0x3f   :  { %1561 = vmatpush.bf16.msrb.mxu3 %v2513_v24  ;;  %v2609_v19 = vor.u32 %v3051_v10, %v2608_v9  ;;  %v2729_v24 = vor.u32 %v3081_v18, %v2728_v17  ;;  %v2592_v33 = vld [vmem:[%s4707_s1 + $0x430] sm:$0xf]  ;;  %v2793_v35 = vor.u32 %v3097_v28, %v2792_v27  ;;  %v3095_v45 = vld [vmem:[%s4707_s1 + $0x5b4] sm:$0xf0]  ;;  %v2712_v46 = vld [vmem:[%s4707_s1 + $0x520] sm:$0xf] }
  0x40   :  { %1505 = vmatpush.bf16.msrb.mxu0 %v2313_v42  ;;  %v2022_v39 = vld [vmem:[%s4708_s0 + $0xac] sm:$0xf0]  ;;  %v3063_v42 = vld [vmem:[%s4707_s1 + $0x4b4] sm:$0xf0]  ;;  %v2028_v49 = vld [vmem:[%s4708_s0 + $0x80] sm:$0xf] }
  0x41   :  { %1524 = vmatpush.bf16.msrb.mxu1 %v2377_v29  ;;  %v2720_v29 = vld [vmem:[%s4707_s1 + $0x530] sm:$0xf]  ;;  %v2902_v55 = vld [vmem:[%s4708_s0 + $0x84] sm:$0xf]  ;;  %v2030_v58 = vld [vmem:[%s4708_s0 + $0xb4] sm:$0xf0] }
  0x42   :  { %1543 = vmatpush.bf16.msrb.mxu2 %v2441_v25  ;;  %v2664_v25 = vld [vmem:[%s4707_s1 + $0x4c0] sm:$0xf]  ;;  %v2721_v40 = vor.u32 %v3079_v30, %v2720_v29  ;;  %v2656_v41 = vld [vmem:[%s4707_s1 + $0x4b0] sm:$0xf]  ;;  %v3045_v62 = vld [vmem:[%s4707_s1 + $0x424] sm:$0xf0]  ;;  %v3829_v14 = vor.u32 %v2902_v55, %v2030_v58 }
  0x43   :  { %1562 = vmatpush.bf16.msrb.mxu3 %v2505_v47  ;;  %1506 = vmatmul.bf16.vlgmr.msrb.gmra.mxu0 %v3682_v0  ;;  %v2665_v32 = vor.u32 %v3065_v26, %v2664_v25  ;;  %v2784_v43 = vld [vmem:[%s4707_s1 + $0x5b0] sm:$0xf]  ;;  %v3077_v47 = vld [vmem:[%s4707_s1 + $0x524] sm:$0xf0]  ;;  %v2584_v61 = vld [vmem:[%s4707_s1 + $0x420] sm:$0xf] }
  0x44   :  { %1574 = vmatpush.bf16.msra.mxu0 %v2625_v52  ;;  %1525 = vmatmul.bf16.vlgmr.msrb.gmra.mxu1 %v3684_v1  ;;  %v2908_v52 = vld [vmem:[%s4708_s0 + $0xb0] sm:$0xf0]  ;;  %v2785_v63 = vor.u32 %v3095_v45, %v2784_v43  ;;  %v2713_v2 = vor.u32 %v3077_v47, %v2712_v46  ;;  %v2648_v3 = vld [vmem:[%s4707_s1 + $0x4a0] sm:$0xf]  ;;  %v3061_v4 = vld [vmem:[%s4707_s1 + $0x4a4] sm:$0xf0]  ;;  %v2585_v15 = vor.u32 %v3045_v62, %v2584_v61 }
  0x45   :  { %1593 = vmatpush.bf16.msra.mxu1 %v2689_v38  ;;  %1544 = vmatmul.bf16.vlgmr.msrb.gmra.mxu2 %v3695_v5  ;;  %v2901_v38 = vld [vmem:[%s4708_s0 + $0x7c] sm:$0xf]  ;;  %v3093_v10 = vld [vmem:[%s4707_s1 + $0x5a4] sm:$0xf0]  ;;  %v3827_v13 = vor.u32 %v2908_v52, %v2028_v49  ;;  %v2649_v16 = vor.u32 %v3061_v4, %v2648_v3  ;;  %v2576_v17 = vld [vmem:[%s4707_s1 + $0x410] sm:$0xf] }
  0x46   :  { %1612 = vmatpush.bf16.msra.mxu2 %v2753_v34  ;;  %1563 = vmatmul.bf16.vlgmr.msrb.gmra.mxu3 %v3697_v6  ;;  %v3047_v34 = vld [vmem:[%s4707_s1 + $0x434] sm:$0xf0]  ;;  %v3816_v9 = vor.u32 %v2901_v38, %v2022_v39  ;;  %v2640_v21 = vld [vmem:[%s4707_s1 + $0x490] sm:$0xf]  ;;  %v2696_v25 = vld [vmem:[%s4707_s1 + $0x500] sm:$0xf] }
  0x47   :  { %1631 = vmatpush.bf16.msra.mxu3 %v2817_v59  ;;  %v2593_v59 = vor.u32 %v3047_v34, %v2592_v33  ;;  %v3043_v18 = vld [vmem:[%s4707_s1 + $0x414] sm:$0xf0]  ;;  %v3073_v26 = vld [vmem:[%s4707_s1 + $0x504] sm:$0xf0]  ;;  %v2942_v27 = vld [vmem:[%s4707_s1 + $0xf4] sm:$0xf] }
  0x48   :  { %1575 = vmatpush.bf16.msra.mxu0 %v2617_v7  ;;  %v2776_v7 = vld [vmem:[%s4707_s1 + $0x5a0] sm:$0xf]  ;;  %v3059_v22 = vld [vmem:[%s4707_s1 + $0x494] sm:$0xf0]  ;;  %v2178_v28 = vld [vmem:[%s4707_s1 + $0xf8] sm:$0xf0]  ;;  %v2577_v29 = vor.u32 %v3043_v18, %v2576_v17 }
  0x49   :  { %1594 = vmatpush.bf16.msra.mxu1 %v2681_v8  ;;  %v3814_v8 = vor.u32 %v2907_v37, %v2020_v36  ;;  %v2641_v30 = vor.u32 %v3059_v22, %v2640_v21  ;;  %v2632_v33 = vld [vmem:[%s4707_s1 + $0x480] sm:$0xf]  ;;  %v3057_v36 = vld [vmem:[%s4707_s1 + $0x484] sm:$0xf0]  ;;  %v2181_v39 = vor.u32 %v2942_v27, %v2178_v28  ;;  %v2114_v43 = vld [vmem:[%s4707_s1 + $0x78] sm:$0xf0] }
  0x4a   :  { %1613 = vmatpush.bf16.msra.mxu2 %v2745_v60  ;;  %v2657_v60 = vor.u32 %v3063_v42, %v2656_v41  ;;  %v2760_v37 = vld [vmem:[%s4707_s1 + $0x580] sm:$0xf]  ;;  %v3089_v38 = vld [vmem:[%s4707_s1 + $0x584] sm:$0xf0]  ;;  %v3119_v41 = vld [vmem:[%s4707_s1 + $0x674] sm:$0xf0]  ;;  %v2633_v49 = vor.u32 %v3057_v36, %v2632_v33 }
  0x4b   :  { %1632 = vmatpush.bf16.msra.mxu3 %v2809_v11  ;;  %v2704_v11 = vld [vmem:[%s4707_s1 + $0x510] sm:$0xf]  ;;  %v2926_v42 = vld [vmem:[%s4707_s1 + $0x74] sm:$0xf]  ;;  %v2242_v46 = vld [vmem:[%s4707_s1 + $0x178] sm:$0xf0]  ;;  %v2761_v58 = vor.u32 %v3089_v38, %v2760_v37 }
  0x4c   :  { %1576 = vmatpush.bf16.msra.mxu0 %v2609_v19  ;;  %v2777_v19 = vor.u32 %v3093_v10, %v2776_v7  ;;  %v2958_v45 = vld [vmem:[%s4707_s1 + $0x174] sm:$0xf]  ;;  %v2940_v52 = vld [vmem:[%s4707_s1 + $0xe4] sm:$0xf]  ;;  %v2170_v55 = vld [vmem:[%s4707_s1 + $0xe8] sm:$0xf0] }
  0x4d   :  { %1595 = vmatpush.bf16.msra.mxu1 %v2673_v20  ;;  %v2890_v61 = vld [vmem:[%s4708_s0 + $0x24] sm:$0xf]  ;;  %v2245_v3 = vor.u32 %v2958_v45, %v2242_v46  ;;  %v2872_v4 = vld [vmem:[%s4707_s1 + $0x660] sm:$0xf]  ;;  %v3117_v7 = vld [vmem:[%s4707_s1 + $0x664] sm:$0xf0] }
  0x4e   :  { %1614 = vmatpush.bf16.msra.mxu2 %v2737_v12  ;;  %v3075_v12 = vld [vmem:[%s4707_s1 + $0x514] sm:$0xf0]  ;;  %v1992_v10 = vld [vmem:[%s4708_s0 + $0x28] sm:$0xf]  ;;  %v2924_v17 = vld [vmem:[%s4707_s1 + $0x64] sm:$0xf] }
  0x4f   :  { %1633 = vmatpush.bf16.msra.mxu3 %v2801_v23  ;;  %v2705_v20 = vor.u32 %v3075_v12, %v2704_v11  ;;  %v2768_v23 = vld [vmem:[%s4707_s1 + $0x590] sm:$0xf]  ;;  %v2897_v11 = vld [vmem:[%s4708_s0 + $0x58] sm:$0xf0]  ;;  %v2891_v12 = vld [vmem:[%s4708_s0 + $0x2c] sm:$0xf] }
  0x50   :  { %1577 = vmatpush.bf16.msra.mxu0 %v2601_v31  ;;  %v2568_v31 = vld [vmem:[%s4707_s1 + $0x400] sm:$0xf]  ;;  %v2106_v18 = vld [vmem:[%s4707_s1 + $0x68] sm:$0xf0]  ;;  %v2938_v22 = vld [vmem:[%s4707_s1 + $0xd4] sm:$0xf]  ;;  %v3965_v28 = vor.u32 %v2897_v11, %v1992_v10 }
  0x51   :  { %1596 = vmatpush.bf16.msra.mxu1 %v2665_v32  ;;  %v3041_v32 = vld [vmem:[%s4707_s1 + $0x404] sm:$0xf0]  ;;  %v2234_v21 = vld [vmem:[%s4707_s1 + $0x168] sm:$0xf0]  ;;  %v3115_v27 = vld [vmem:[%s4707_s1 + $0x654] sm:$0xf0] }
  0x52   :  { %1615 = vmatpush.bf16.msra.mxu2 %v2729_v24  ;;  %v3091_v24 = vld [vmem:[%s4707_s1 + $0x594] sm:$0xf0]  ;;  %v2569_v47 = vor.u32 %v3041_v32, %v2568_v31  ;;  %v2922_v32 = vld [vmem:[%s4707_s1 + $0x54] sm:$0xf]  ;;  %v2098_v33 = vld [vmem:[%s4707_s1 + $0x58] sm:$0xf0] }
  0x53   :  { %1634 = vmatpush.bf16.msra.mxu3 %v2793_v35  ;;  %1511 = vmatmul.bf16.gmra.mxu0 %v3814_v8  ;;  %v2769_v34 = vor.u32 %v3091_v24, %v2768_v23  ;;  %v2697_v35 = vor.u32 %v3073_v26, %v2696_v25  ;;  %v2162_v25 = vld [vmem:[%s4707_s1 + $0xd8] sm:$0xf0]  ;;  %v2864_v26 = vld [vmem:[%s4707_s1 + $0x650] sm:$0xf]  ;;  %v2954_v36 = vld [vmem:[%s4707_s1 + $0x154] sm:$0xf] }
  0x54   :  { %1578 = vmatpush.bf16.msra.mxu0 %v2593_v59  ;;  %1530 = vmatmul.bf16.gmra.mxu1 %v3816_v9  ;;  %v1984_v59 = vld [vmem:[%s4708_s0 + $0x20] sm:$0xf]  ;;  %v2226_v37 = vld [vmem:[%s4707_s1 + $0x158] sm:$0xf0]  ;;  %v2936_v38 = vld [vmem:[%s4707_s1 + $0xc4] sm:$0xf] }
  0x55   :  { %1597 = vmatpush.bf16.msra.mxu1 %v2657_v60  ;;  %1549 = vmatmul.bf16.gmra.mxu2 %v3827_v13  ;;  %v2896_v60 = vld [vmem:[%s4708_s0 + $0x50] sm:$0xf0]  ;;  %v2920_v45 = vld [vmem:[%s4707_s1 + $0x44] sm:$0xf]  ;;  %v2090_v46 = vld [vmem:[%s4707_s1 + $0x48] sm:$0xf0] }
  0x56   :  { %1616 = vmatpush.bf16.msra.mxu2 %v2721_v40  ;;  %1568 = vmatmul.bf16.gmra.mxu3 %v3829_v14  ;;  %v2880_v40 = vld [vmem:[%s4707_s1 + $0x670] sm:$0xf]  ;;  %v3952_v23 = vor.u32 %v2896_v60, %v1984_v59  ;;  %v2146_v59 = vld [vmem:[%s4707_s1 + $0xb8] sm:$0xf0]  ;;  %v2903_v10 = vld [vmem:[%s4708_s0 + $0x8c] sm:$0xf] }
  0x57   :  { %1635 = vmatpush.bf16.msra.mxu3 %v2785_v63  ;;  %v2881_v62 = vor.u32 %v3119_v41, %v2880_v40  ;;  %v1986_v63 = vld [vmem:[%s4708_s0 + $0x54] sm:$0xf0]  ;;  %v2856_v40 = vld [vmem:[%s4707_s1 + $0x640] sm:$0xf]  ;;  %v3113_v41 = vld [vmem:[%s4707_s1 + $0x644] sm:$0xf0] }
  0x58   :  { %1579 = vmatpush.bf16.msra.mxu0 %v2585_v15  ;;  %v2173_v15 = vor.u32 %v2940_v52, %v2170_v55  ;;  %v3954_v24 = vor.u32 %v2890_v61, %v1986_v63  ;;  %v2952_v52 = vld [vmem:[%s4707_s1 + $0x144] sm:$0xf]  ;;  %v2218_v55 = vld [vmem:[%s4707_s1 + $0x148] sm:$0xf0]  ;;  %v2848_v60 = vld [vmem:[%s4707_s1 + $0x630] sm:$0xf] }
  0x59   :  { %1598 = vmatpush.bf16.msra.mxu1 %v2649_v16  ;;  %v1994_v16 = vld [vmem:[%s4708_s0 + $0x5c] sm:$0xf0]  ;;  %v3111_v61 = vld [vmem:[%s4707_s1 + $0x634] sm:$0xf0]  ;;  %v2221_v63 = vor.u32 %v2952_v52, %v2218_v55  ;;  %v2914_v52 = vld [vmem:[%s4707_s1 + $0x14] sm:$0xf] }
  0x5a   :  { %1617 = vmatpush.bf16.msra.mxu2 %v2713_v2  ;;  %v2117_v2 = vor.u32 %v2926_v42, %v2114_v43  ;;  %v2101_v42 = vor.u32 %v2922_v32, %v2098_v33  ;;  %v2229_v43 = vor.u32 %v2954_v36, %v2226_v37  ;;  %v2038_v11 = vld [vmem:[%s4708_s0 + $0xbc] sm:$0xf0]  ;;  %v2916_v32 = vld [vmem:[%s4707_s1 + $0x24] sm:$0xf]  ;;  %v2074_v33 = vld [vmem:[%s4707_s1 + $0x28] sm:$0xf0] }
  0x5b   :  { %1636 = vmatpush.bf16.msra.mxu3 %v2777_v19  ;;  %v2873_v19 = vor.u32 %v3117_v7, %v2872_v4  ;;  %v2036_v4 = vld [vmem:[%s4708_s0 + $0x88] sm:$0xf]  ;;  %v2909_v7 = vld [vmem:[%s4708_s0 + $0xb8] sm:$0xf0]  ;;  %v2948_v36 = vld [vmem:[%s4707_s1 + $0x124] sm:$0xf] }
  0x5c   :  { %1580 = vmatpush.bf16.msra.mxu0 %v2577_v29  ;;  %v3967_v29 = vor.u32 %v2891_v12, %v1994_v16  ;;  %v2950_v16 = vld [vmem:[%s4707_s1 + $0x134] sm:$0xf]  ;;  %v2202_v37 = vld [vmem:[%s4707_s1 + $0x128] sm:$0xf0]  ;;  %v2066_v55 = vld [vmem:[%s4707_s1 + $0x18] sm:$0xf0] }
  0x5d   :  { %1599 = vmatpush.bf16.msra.mxu1 %v2641_v30  ;;  %v2109_v30 = vor.u32 %v2924_v17, %v2106_v18  ;;  %v2210_v17 = vld [vmem:[%s4707_s1 + $0x138] sm:$0xf0]  ;;  %v2932_v18 = vld [vmem:[%s4707_s1 + $0xa4] sm:$0xf] }
  0x5e   :  { %1618 = vmatpush.bf16.msra.mxu2 %v2705_v20  ;;  %v2956_v20 = vld [vmem:[%s4707_s1 + $0x164] sm:$0xf] }
  0x5f   :  { %1637 = vmatpush.bf16.msra.mxu3 %v2769_v34  ;;  %v2237_v31 = vor.u32 %v2956_v20, %v2234_v21  ;;  %v2165_v34 = vor.u32 %v2938_v22, %v2162_v25  ;;  %v2840_v20 = vld [vmem:[%s4707_s1 + $0x620] sm:$0xf]  ;;  %v3109_v21 = vld [vmem:[%s4707_s1 + $0x624] sm:$0xf0]  ;;  %v2044_v22 = vld [vmem:[%s4708_s0 + $0x90] sm:$0xf] }
  0x60   :  { %1581 = vmatpush.bf16.msra.mxu0 %v2569_v47  ;;  %v2910_v25 = vld [vmem:[%s4708_s0 + $0xc0] sm:$0xf0] }
  0x61   :  { %1600 = vmatpush.bf16.msra.mxu1 %v2633_v49  ;;  %v2857_v49 = vor.u32 %v3113_v41, %v2856_v40  ;;  %v4086_v40 = vor.u32 %v2903_v10, %v2038_v11  ;;  %v2130_v41 = vld [vmem:[%s4707_s1 + $0x98] sm:$0xf0]  ;;  %v2974_v10 = vld [vmem:[%s4707_s1 + $0x1f4] sm:$0xf] }
  0x62   :  { %1619 = vmatpush.bf16.msra.mxu2 %v2697_v35  ;;  %v2865_v35 = vor.u32 %v3115_v27, %v2864_v26  ;;  %v2904_v26 = vld [vmem:[%s4708_s0 + $0x94] sm:$0xf]  ;;  %v2046_v27 = vld [vmem:[%s4708_s0 + $0xc4] sm:$0xf0]  ;;  %v2306_v11 = vld [vmem:[%s4707_s1 + $0x1f8] sm:$0xf0] }
  0x63   :  { %1638 = vmatpush.bf16.msra.mxu3 %v2761_v58  ;;  %1582 = vmatmul.bf16.vlgmr.msra.gmra.mxu0 %v3952_v23  ;;  %v2934_v58 = vld [vmem:[%s4707_s1 + $0xb4] sm:$0xf] }
  0x64   :  { %1650 = vmatpush.bf16.msrb.mxu0 %v2881_v62  ;;  %1601 = vmatmul.bf16.vlgmr.msra.gmra.mxu1 %v3954_v24  ;;  %v2093_v62 = vor.u32 %v2920_v45, %v2090_v46  ;;  %v2149_v12 = vor.u32 %v2934_v58, %v2146_v59  ;;  %v4097_v45 = vor.u32 %v2910_v25, %v2044_v22  ;;  %v2946_v58 = vld [vmem:[%s4707_s1 + $0x114] sm:$0xf]  ;;  %v2370_v25 = vld [vmem:[%s4707_s1 + $0x278] sm:$0xf0] }
  0x65   :  { %1669 = vmatpush.bf16.msrb.mxu1 %v2117_v2  ;;  %1620 = vmatmul.bf16.vlgmr.msra.gmra.mxu2 %v3965_v28  ;;  %v2918_v2 = vld [vmem:[%s4707_s1 + $0x34] sm:$0xf]  ;;  %v4099_v46 = vor.u32 %v2904_v26, %v2046_v27  ;;  %v2309_v27 = vor.u32 %v2974_v10, %v2306_v11  ;;  %v2354_v10 = vld [vmem:[%s4707_s1 + $0x258] sm:$0xf0] }
  0x66   :  { %1688 = vmatpush.bf16.msrb.mxu2 %v2181_v39  ;;  %v2154_v39 = vld [vmem:[%s4707_s1 + $0xc8] sm:$0xf0]  ;;  %1639 = vmatmul.bf16.vlgmr.msra.gmra.mxu3 %v3967_v29  ;;  %v2990_v22 = vld [vmem:[%s4707_s1 + $0x274] sm:$0xf] }
  0x67   :  { %1707 = vmatpush.bf16.msrb.mxu3 %v2245_v3  ;;  %v2157_v47 = vor.u32 %v2936_v38, %v2154_v39  ;;  %v2082_v3 = vld [vmem:[%s4707_s1 + $0x38] sm:$0xf0]  ;;  %v2930_v38 = vld [vmem:[%s4707_s1 + $0x94] sm:$0xf]  ;;  %v4084_v39 = vor.u32 %v2909_v7, %v2036_v4 }
  0x68   :  { %1651 = vmatpush.bf16.msrb.mxu0 %v2873_v19  ;;  %v2138_v19 = vld [vmem:[%s4707_s1 + $0xa8] sm:$0xf0]  ;;  %v2133_v59 = vor.u32 %v2930_v38, %v2130_v41  ;;  %v3006_v4 = vld [vmem:[%s4707_s1 + $0x2f4] sm:$0xf]  ;;  %v2434_v7 = vld [vmem:[%s4707_s1 + $0x2f8] sm:$0xf0]  ;;  %v2373_v38 = vor.u32 %v2990_v22, %v2370_v25 }
  0x69   :  { %1670 = vmatpush.bf16.msrb.mxu1 %v2109_v30  ;;  %v2085_v30 = vor.u32 %v2918_v2, %v2082_v3  ;;  %v2824_v2 = vld [vmem:[%s4707_s1 + $0x600] sm:$0xf]  ;;  %v3105_v3 = vld [vmem:[%s4707_s1 + $0x604] sm:$0xf0]  ;;  %v2437_v26 = vor.u32 %v3006_v4, %v2434_v7  ;;  %v2986_v4 = vld [vmem:[%s4707_s1 + $0x254] sm:$0xf] }
  0x6a   :  { %1689 = vmatpush.bf16.msrb.mxu2 %v2173_v15  ;;  %v2849_v15 = vor.u32 %v3111_v61, %v2848_v60  ;;  %v2194_v61 = vld [vmem:[%s4707_s1 + $0x118] sm:$0xf0]  ;;  %v3018_v11 = vld [vmem:[%s4707_s1 + $0x354] sm:$0xf]  ;;  %v2282_v22 = vld [vmem:[%s4707_s1 + $0x1c8] sm:$0xf0] }
  0x6b   :  { %1708 = vmatpush.bf16.msrb.mxu3 %v2237_v31  ;;  %v2213_v31 = vor.u32 %v2950_v16, %v2210_v17  ;;  %v2912_v16 = vld [vmem:[%s4707_s1 + $0x4] sm:$0xf]  ;;  %v2058_v17 = vld [vmem:[%s4707_s1 + $0x8] sm:$0xf0] }
  0x6c   :  { %1652 = vmatpush.bf16.msrb.mxu0 %v2865_v35  ;;  %v2841_v35 = vor.u32 %v3109_v21, %v2840_v20  ;;  %v2825_v20 = vor.u32 %v3105_v3, %v2824_v2  ;;  %v2186_v21 = vld [vmem:[%s4707_s1 + $0x108] sm:$0xf0]  ;;  %v2970_v2 = vld [vmem:[%s4707_s1 + $0x1d4] sm:$0xf]  ;;  %v2290_v3 = vld [vmem:[%s4707_s1 + $0x1d8] sm:$0xf0] }
  0x6d   :  { %1671 = vmatpush.bf16.msrb.mxu1 %v2101_v42  ;;  %v2832_v42 = vld [vmem:[%s4707_s1 + $0x610] sm:$0xf]  ;;  %v2984_v25 = vld [vmem:[%s4707_s1 + $0x244] sm:$0xf] }
  0x6e   :  { %1690 = vmatpush.bf16.msrb.mxu2 %v2165_v34  ;;  %v2141_v34 = vor.u32 %v2932_v18, %v2138_v19  ;;  %v2944_v18 = vld [vmem:[%s4707_s1 + $0x104] sm:$0xf] }
  0x6f   :  { %1709 = vmatpush.bf16.msrb.mxu3 %v2229_v43  ;;  %v3107_v43 = vld [vmem:[%s4707_s1 + $0x614] sm:$0xf0] }
  0x70   :  { %1653 = vmatpush.bf16.msrb.mxu0 %v2857_v49  ;;  %v2205_v49 = vor.u32 %v2948_v36, %v2202_v37  ;;  %v2833_v60 = vor.u32 %v3107_v43, %v2832_v42  ;;  %v2061_v36 = vor.u32 %v2912_v16, %v2058_v17  ;;  %v2189_v37 = vor.u32 %v2944_v18, %v2186_v21  ;;  %v2988_v42 = vld [vmem:[%s4707_s1 + $0x264] sm:$0xf]  ;;  %v2410_v18 = vld [vmem:[%s4707_s1 + $0x2c8] sm:$0xf0] }
  0x71   :  { %1672 = vmatpush.bf16.msrb.mxu1 %v2093_v62  ;;  %v2928_v62 = vld [vmem:[%s4707_s1 + $0x84] sm:$0xf]  ;;  %v2293_v16 = vor.u32 %v2970_v2, %v2290_v3  ;;  %v2052_v2 = vld [vmem:[%s4708_s0 + $0x98] sm:$0xf]  ;;  %v2911_v3 = vld [vmem:[%s4708_s0 + $0xc8] sm:$0xf0] }
  0x72   :  { %1691 = vmatpush.bf16.msrb.mxu2 %v2157_v47  ;;  %v2077_v47 = vor.u32 %v2916_v32, %v2074_v33  ;;  %v3004_v32 = vld [vmem:[%s4707_s1 + $0x2e4] sm:$0xf]  ;;  %v2426_v33 = vld [vmem:[%s4707_s1 + $0x2e8] sm:$0xf0] }
  0x73   :  { %1710 = vmatpush.bf16.msrb.mxu3 %v2221_v63  ;;  %v2122_v63 = vld [vmem:[%s4707_s1 + $0x88] sm:$0xf0]  ;;  %1587 = vmatmul.bf16.gmra.mxu0 %v4084_v39  ;;  %v2429_v43 = vor.u32 %v3004_v32, %v2426_v33  ;;  %v3000_v17 = vld [vmem:[%s4707_s1 + $0x2c4] sm:$0xf]  ;;  %v2998_v32 = vld [vmem:[%s4707_s1 + $0x2b4] sm:$0xf] }
  0x74   :  { %1654 = vmatpush.bf16.msrb.mxu0 %v2849_v15  ;;  %1606 = vmatmul.bf16.gmra.mxu1 %v4086_v40  ;;  %v2197_v15 = vor.u32 %v2946_v58, %v2194_v61  ;;  %v2125_v19 = vor.u32 %v2928_v62, %v2122_v63  ;;  %v2000_v58 = vld [vmem:[%s4708_s0 + $0x30] sm:$0xf]  ;;  %v2418_v61 = vld [vmem:[%s4707_s1 + $0x2d8] sm:$0xf0]  ;;  %v2968_v21 = vld [vmem:[%s4707_s1 + $0x1c4] sm:$0xf] }
  0x75   :  { %1673 = vmatpush.bf16.msrb.mxu1 %v2085_v30  ;;  %1625 = vmatmul.bf16.gmra.mxu2 %v4097_v45  ;;  %v3022_v30 = vld [vmem:[%s4707_s1 + $0x374] sm:$0xf]  ;;  %v2402_v33 = vld [vmem:[%s4707_s1 + $0x2b8] sm:$0xf0] }
  0x76   :  { %1692 = vmatpush.bf16.msrb.mxu2 %v2149_v12  ;;  %1644 = vmatmul.bf16.gmra.mxu3 %v4099_v46  ;;  %v2069_v12 = vor.u32 %v2914_v52, %v2066_v55  ;;  %v3020_v52 = vld [vmem:[%s4707_s1 + $0x364] sm:$0xf]  ;;  %v2490_v55 = vld [vmem:[%s4707_s1 + $0x368] sm:$0xf0] }
  0x77   :  { %1711 = vmatpush.bf16.msrb.mxu3 %v2213_v31  ;;  %v2498_v31 = vld [vmem:[%s4707_s1 + $0x378] sm:$0xf0]  ;;  %v2493_v63 = vor.u32 %v3020_v52, %v2490_v55 }
  0x78   :  { %1655 = vmatpush.bf16.msrb.mxu0 %v2841_v35  ;;  %v2298_v35 = vld [vmem:[%s4707_s1 + $0x1e8] sm:$0xf0]  ;;  %v2501_v41 = vor.u32 %v3022_v30, %v2498_v31  ;;  %v2413_v31 = vor.u32 %v3000_v17, %v2410_v18  ;;  %v2962_v17 = vld [vmem:[%s4707_s1 + $0x194] sm:$0xf]  ;;  %v2258_v18 = vld [vmem:[%s4707_s1 + $0x198] sm:$0xf0] }
  0x79   :  { %1674 = vmatpush.bf16.msrb.mxu1 %v2077_v47  ;;  %v2474_v30 = vld [vmem:[%s4707_s1 + $0x348] sm:$0xf0] }
  0x7a   :  { %1693 = vmatpush.bf16.msrb.mxu2 %v2141_v34  ;;  %v2972_v34 = vld [vmem:[%s4707_s1 + $0x1e4] sm:$0xf] }
  0x7b   :  { %1712 = vmatpush.bf16.msrb.mxu3 %v2205_v49  ;;  %v2301_v47 = vor.u32 %v2972_v34, %v2298_v35  ;;  %v2362_v49 = vld [vmem:[%s4707_s1 + $0x268] sm:$0xf0] }
  0x7c   :  { %1656 = vmatpush.bf16.msrb.mxu0 %v2833_v60  ;;  %v3002_v60 = vld [vmem:[%s4707_s1 + $0x2d4] sm:$0xf]  ;;  %v2365_v62 = vor.u32 %v2988_v42, %v2362_v49  ;;  %v2405_v42 = vor.u32 %v2998_v32, %v2402_v33  ;;  %v2394_v49 = vld [vmem:[%s4707_s1 + $0x2a8] sm:$0xf0] }
  0x7d   :  { %1675 = vmatpush.bf16.msrb.mxu1 %v2069_v12  ;;  %v2482_v12 = vld [vmem:[%s4707_s1 + $0x358] sm:$0xf0]  ;;  %v2250_v32 = vld [vmem:[%s4707_s1 + $0x188] sm:$0xf0] }
  0x7e   :  { %1694 = vmatpush.bf16.msrb.mxu2 %v2133_v59  ;;  %v2898_v59 = vld [vmem:[%s4708_s0 + $0x60] sm:$0xf0] }
  0x7f   :  { %1713 = vmatpush.bf16.msrb.mxu3 %v2197_v15  ;;  %v4210_v7 = vor.u32 %v2898_v59, %v2000_v58  ;;  %v2421_v15 = vor.u32 %v3002_v60, %v2418_v61  ;;  %v2964_v58 = vld [vmem:[%s4707_s1 + $0x1a4] sm:$0xf]  ;;  %v2266_v59 = vld [vmem:[%s4707_s1 + $0x1a8] sm:$0xf0] }
  0x80   :  { %1657 = vmatpush.bf16.msrb.mxu0 %v2825_v20  ;;  %v2485_v20 = vor.u32 %v3018_v11, %v2482_v12  ;;  %v2980_v60 = vld [vmem:[%s4707_s1 + $0x224] sm:$0xf]  ;;  %v2330_v61 = vld [vmem:[%s4707_s1 + $0x228] sm:$0xf0]  ;;  %v2994_v11 = vld [vmem:[%s4707_s1 + $0x294] sm:$0xf] }
  0x81   :  { %1676 = vmatpush.bf16.msrb.mxu1 %v2061_v36  ;;  %v2982_v36 = vld [vmem:[%s4707_s1 + $0x234] sm:$0xf]  ;;  %v2386_v12 = vld [vmem:[%s4707_s1 + $0x298] sm:$0xf0] }
  0x82   :  { %1695 = vmatpush.bf16.msrb.mxu2 %v2125_v19  ;;  %v2357_v19 = vor.u32 %v2986_v4, %v2354_v10  ;;  %v2269_v10 = vor.u32 %v2964_v58, %v2266_v59 }
  0x83   :  { %1714 = vmatpush.bf16.msrb.mxu3 %v2189_v37  ;;  %1658 = vmatmul.bf16.vlgmr.msrb.gmra.mxu0 %v4210_v7  ;;  %v2338_v37 = vld [vmem:[%s4707_s1 + $0x238] sm:$0xf0] }
  0x84   :  { %1726 = vmatpush.bf16.msra.mxu0 %v2309_v27  ;;  %1677 = vmatmul.bf16.vlgmr.msrb.gmra.mxu1 %v3394_v48  ;;  %v3016_v27 = vld [vmem:[%s4707_s1 + $0x344] sm:$0xf]  ;;  %v2285_v48 = vor.u32 %v2968_v21, %v2282_v22  ;;  %v2341_v52 = vor.u32 %v2982_v36, %v2338_v37  ;;  %v2322_v21 = vld [vmem:[%s4707_s1 + $0x218] sm:$0xf0]  ;;  %v3010_v22 = vld [vmem:[%s4707_s1 + $0x314] sm:$0xf] }
  0x85   :  { %1745 = vmatpush.bf16.msra.mxu1 %v2373_v38  ;;  %1696 = vmatmul.bf16.vlgmr.msrb.gmra.mxu2 %v3405_v53  ;;  %v2477_v35 = vor.u32 %v3016_v27, %v2474_v30  ;;  %v2966_v53 = vld [vmem:[%s4707_s1 + $0x1b4] sm:$0xf]  ;;  %v2389_v27 = vor.u32 %v2994_v11, %v2386_v12  ;;  %v2261_v30 = vor.u32 %v2962_v17, %v2258_v18  ;;  %v2442_v36 = vld [vmem:[%s4707_s1 + $0x308] sm:$0xf0]  ;;  %v3084_v11 = vld [vmem:[%s4707_s1 + $0x564] sm:$0xf] }
  0x86   :  { %1764 = vmatpush.bf16.msra.mxu2 %v2437_v26  ;;  %v2346_v26 = vld [vmem:[%s4707_s1 + $0x248] sm:$0xf0]  ;;  %1715 = vmatmul.bf16.vlgmr.msrb.gmra.mxu3 %v3407_v54  ;;  %v2274_v54 = vld [vmem:[%s4707_s1 + $0x1b8] sm:$0xf0]  ;;  %v3014_v38 = vld [vmem:[%s4707_s1 + $0x334] sm:$0xf] }
  0x87   :  { %1783 = vmatpush.bf16.msra.mxu3 %v2501_v41  ;;  %v2349_v34 = vor.u32 %v2984_v25, %v2346_v26  ;;  %v2466_v41 = vld [vmem:[%s4707_s1 + $0x338] sm:$0xf0]  ;;  %v2992_v26 = vld [vmem:[%s4707_s1 + $0x284] sm:$0xf]  ;;  %v3070_v37 = vld [vmem:[%s4707_s1 + $0x4f4] sm:$0xf] }
  0x88   :  { %1727 = vmatpush.bf16.msra.mxu0 %v2301_v47  ;;  %v2996_v47 = vld [vmem:[%s4707_s1 + $0x2a4] sm:$0xf]  ;;  %v2469_v55 = vor.u32 %v3014_v38, %v2466_v41  ;;  %v2450_v25 = vld [vmem:[%s4707_s1 + $0x318] sm:$0xf0]  ;;  %v2746_v12 = vld [vmem:[%s4707_s1 + $0x568] sm:$0xf0] }
  0x89   :  { %1746 = vmatpush.bf16.msra.mxu1 %v2365_v62  ;;  %v3012_v62 = vld [vmem:[%s4707_s1 + $0x324] sm:$0xf]  ;;  %v2397_v4 = vor.u32 %v2996_v47, %v2394_v49  ;;  %v2690_v38 = vld [vmem:[%s4707_s1 + $0x4f8] sm:$0xf0]  ;;  %v2749_v18 = vor.u32 %v3084_v11, %v2746_v12 }
  0x8a   :  { %1765 = vmatpush.bf16.msra.mxu2 %v2429_v43  ;;  %v2277_v43 = vor.u32 %v2966_v53, %v2274_v54  ;;  %v2314_v53 = vld [vmem:[%s4707_s1 + $0x208] sm:$0xf0]  ;;  %v3008_v54 = vld [vmem:[%s4707_s1 + $0x304] sm:$0xf]  ;;  %v2562_v41 = vld [vmem:[%s4707_s1 + $0x3f8] sm:$0xf0]  ;;  %v2693_v58 = vor.u32 %v3070_v37, %v2690_v38 }
  0x8b   :  { %1784 = vmatpush.bf16.msra.mxu3 %v2493_v63  ;;  %v2458_v63 = vld [vmem:[%s4707_s1 + $0x328] sm:$0xf0]  ;;  %v2754_v49 = vld [vmem:[%s4707_s1 + $0x578] sm:$0xf0]  ;;  %v3032_v38 = vld [vmem:[%s4707_s1 + $0x3c4] sm:$0xf] }
  0x8c   :  { %1728 = vmatpush.bf16.msra.mxu0 %v2293_v16  ;;  %v2461_v16 = vor.u32 %v3012_v62, %v2458_v63 }
  0x8d   :  { %1747 = vmatpush.bf16.msra.mxu1 %v2357_v19  ;;  %v2978_v19 = vld [vmem:[%s4707_s1 + $0x214] sm:$0xf] }
  0x8e   :  { %1766 = vmatpush.bf16.msra.mxu2 %v2421_v15  ;;  %v2333_v15 = vor.u32 %v2980_v60, %v2330_v61  ;;  %v2325_v33 = vor.u32 %v2978_v19, %v2322_v21  ;;  %v3068_v60 = vld [vmem:[%s4707_s1 + $0x4e4] sm:$0xf]  ;;  %v2682_v61 = vld [vmem:[%s4707_s1 + $0x4e8] sm:$0xf0]  ;;  %v3066_v19 = vld [vmem:[%s4707_s1 + $0x4d4] sm:$0xf] }
  0x8f   :  { %1785 = vmatpush.bf16.msra.mxu3 %v2485_v20  ;;  %v4318_v20 = vor.u32 %v2911_v3, %v2052_v2  ;;  %v3036_v2 = vld [vmem:[%s4707_s1 + $0x3e4] sm:$0xf]  ;;  %v2554_v3 = vld [vmem:[%s4707_s1 + $0x3e8] sm:$0xf0]  ;;  %v2674_v21 = vld [vmem:[%s4707_s1 + $0x4d8] sm:$0xf0] }
  0x90   :  { %1729 = vmatpush.bf16.msra.mxu0 %v2285_v48  ;;  %v2960_v48 = vld [vmem:[%s4707_s1 + $0x184] sm:$0xf] }
  0x91   :  { %1748 = vmatpush.bf16.msra.mxu1 %v2349_v34  ;;  %v2453_v34 = vor.u32 %v3010_v22, %v2450_v25  ;;  %v2253_v47 = vor.u32 %v2960_v48, %v2250_v32  ;;  %v3034_v22 = vld [vmem:[%s4707_s1 + $0x3d4] sm:$0xf]  ;;  %v2546_v25 = vld [vmem:[%s4707_s1 + $0x3d8] sm:$0xf0] }
  0x92   :  { %1767 = vmatpush.bf16.msra.mxu2 %v2413_v31  ;;  %v2378_v31 = vld [vmem:[%s4707_s1 + $0x288] sm:$0xf0]  ;;  %v2738_v48 = vld [vmem:[%s4707_s1 + $0x558] sm:$0xf0] }
  0x93   :  { %1786 = vmatpush.bf16.msra.mxu3 %v2477_v35  ;;  %v2976_v35 = vld [vmem:[%s4707_s1 + $0x204] sm:$0xf]  ;;  %1663 = vmatmul.bf16.gmra.mxu0 %v4318_v20 }
  0x94   :  { %1730 = vmatpush.bf16.msra.mxu0 %v2277_v43  ;;  %1682 = vmatmul.bf16.gmra.mxu1 %v3526_v44  ;;  %v3038_v44 = vld [vmem:[%s4707_s1 + $0x3f4] sm:$0xf]  ;;  %v2381_v43 = vor.u32 %v2992_v26, %v2378_v31 }
  0x95   :  { %1749 = vmatpush.bf16.msra.mxu1 %v2341_v52  ;;  %1701 = vmatmul.bf16.gmra.mxu2 %v3537_v50  ;;  %v2626_v50 = vld [vmem:[%s4707_s1 + $0x478] sm:$0xf0]  ;;  %v2317_v52 = vor.u32 %v2976_v35, %v2314_v53  ;;  %v2565_v59 = vor.u32 %v3038_v44, %v2562_v41  ;;  %v3050_v26 = vld [vmem:[%s4707_s1 + $0x454] sm:$0xf]  ;;  %v2549_v35 = vor.u32 %v3034_v22, %v2546_v25  ;;  %v3064_v53 = vld [vmem:[%s4707_s1 + $0x4c4] sm:$0xf] }
  0x96   :  { %1768 = vmatpush.bf16.msra.mxu2 %v2405_v42  ;;  %1720 = vmatmul.bf16.gmra.mxu3 %v3539_v51  ;;  %v3054_v42 = vld [vmem:[%s4707_s1 + $0x474] sm:$0xf]  ;;  %v2538_v44 = vld [vmem:[%s4707_s1 + $0x3c8] sm:$0xf0]  ;;  %v3048_v41 = vld [vmem:[%s4707_s1 + $0x444] sm:$0xf] }
  0x97   :  { %1787 = vmatpush.bf16.msra.mxu3 %v2469_v55  ;;  %v3086_v51 = vld [vmem:[%s4707_s1 + $0x574] sm:$0xf]  ;;  %v2445_v55 = vor.u32 %v3008_v54, %v2442_v36  ;;  %v2629_v62 = vor.u32 %v3054_v42, %v2626_v50  ;;  %v2666_v54 = vld [vmem:[%s4707_s1 + $0x4c8] sm:$0xf0]  ;;  %v3044_v22 = vld [vmem:[%s4707_s1 + $0x424] sm:$0xf] }
  0x98   :  { %1731 = vmatpush.bf16.msra.mxu0 %v2269_v10  ;;  %v2757_v63 = vor.u32 %v3086_v51, %v2754_v49  ;;  %v2618_v10 = vld [vmem:[%s4707_s1 + $0x468] sm:$0xf0]  ;;  %v3082_v31 = vld [vmem:[%s4707_s1 + $0x554] sm:$0xf]  ;;  %v2658_v51 = vld [vmem:[%s4707_s1 + $0x4b8] sm:$0xf0] }
  0x99   :  { %1750 = vmatpush.bf16.msra.mxu1 %v2333_v15  ;;  %v2685_v15 = vor.u32 %v3068_v60, %v2682_v61  ;;  %v2741_v37 = vor.u32 %v3082_v31, %v2738_v48  ;;  %v2602_v42 = vld [vmem:[%s4707_s1 + $0x448] sm:$0xf0]  ;;  %v3062_v50 = vld [vmem:[%s4707_s1 + $0x4b4] sm:$0xf] }
  0x9a   :  { %1769 = vmatpush.bf16.msra.mxu2 %v2397_v4  ;;  %v3052_v4 = vld [vmem:[%s4707_s1 + $0x464] sm:$0xf]  ;;  %v2586_v25 = vld [vmem:[%s4707_s1 + $0x428] sm:$0xf0]  ;;  %v3058_v48 = vld [vmem:[%s4707_s1 + $0x494] sm:$0xf] }
  0x9b   :  { %1788 = vmatpush.bf16.msra.mxu3 %v2461_v16  ;;  %v2557_v16 = vor.u32 %v3036_v2, %v2554_v3  ;;  %v2621_v17 = vor.u32 %v3052_v4, %v2618_v10  ;;  %v2722_v2 = vld [vmem:[%s4707_s1 + $0x538] sm:$0xf0]  ;;  %v2661_v4 = vor.u32 %v3062_v50, %v2658_v51 }
  0x9c   :  { %1732 = vmatpush.bf16.msra.mxu0 %v2261_v30  ;;  %v2610_v30 = vld [vmem:[%s4707_s1 + $0x458] sm:$0xf0] }
  0x9d   :  { %1751 = vmatpush.bf16.msra.mxu1 %v2325_v33  ;;  %v2613_v36 = vor.u32 %v3050_v26, %v2610_v30  ;;  %v3076_v26 = vld [vmem:[%s4707_s1 + $0x524] sm:$0xf] }
  0x9e   :  { %1770 = vmatpush.bf16.msra.mxu2 %v2389_v27 }
  0x9f   :  { %1789 = vmatpush.bf16.msra.mxu3 %v2453_v34  ;;  %v2677_v34 = vor.u32 %v3066_v19, %v2674_v21  ;;  %v3028_v19 = vld [vmem:[%s4707_s1 + $0x3a4] sm:$0xf]  ;;  %v2522_v21 = vld [vmem:[%s4707_s1 + $0x3a8] sm:$0xf0] }
  0xa0   :  { %1733 = vmatpush.bf16.msra.mxu0 %v2253_v47  ;;  %v1431_v27 = vpop.f32.mrf.mxu0  ;;  %v2730_v47 = vld [vmem:[%s4707_s1 + $0x548] sm:$0xf0]  ;;  %v2525_v31 = vor.u32 %v3028_v19, %v2522_v21  ;;  %v3100_v21 = vld [vmem:[%s4707_s1 + $0x5e4] sm:$0xf] }
  0xa1   :  { %1752 = vmatpush.bf16.msra.mxu1 %v2317_v52  ;;  %v1450_v32 = vpop.f32.mrf.mxu1  ;;  %v2605_v52 = vor.u32 %v3048_v41, %v2602_v42  ;;  %v2578_v41 = vld [vmem:[%s4707_s1 + $0x418] sm:$0xf0]  ;;  %v3074_v42 = vld [vmem:[%s4707_s1 + $0x514] sm:$0xf] }
  0xa2   :  { %1771 = vmatpush.bf16.msra.mxu2 %v2381_v43  ;;  %v1451_v33 = vadd.f32 %v1450_v32, %v1431_v27  ;;  %v3080_v43 = vld [vmem:[%s4707_s1 + $0x544] sm:$0xf]  ;;  %v2714_v27 = vld [vmem:[%s4707_s1 + $0x528] sm:$0xf0]  ;;  %v2642_v32 = vld [vmem:[%s4707_s1 + $0x498] sm:$0xf0] }
  0xa3   :  { %1790 = vmatpush.bf16.msra.mxu3 %v2445_v55  ;;  %1734 = vmatmul.bf16.vlgmr.msra.gmra.mxu0 %v3415_v57  ;;  %v2669_v57 = vor.u32 %v3064_v53, %v2666_v54  ;;  %v2733_v55 = vor.u32 %v3080_v43, %v2730_v47  ;;  %v3026_v53 = vld [vmem:[%s4707_s1 + $0x394] sm:$0xf]  ;;  %v2514_v54 = vld [vmem:[%s4707_s1 + $0x398] sm:$0xf0] }
  0xa4   :  { %1802 = vmatpush.bf16.msrb.mxu0 %v2565_v59  ;;  %1753 = vmatmul.bf16.vlgmr.msra.gmra.mxu1 %v3682_v0  ;;  %v2541_v0 = vor.u32 %v3032_v38, %v2538_v44  ;;  %v2706_v43 = vld [vmem:[%s4707_s1 + $0x518] sm:$0xf0]  ;;  %v2517_v51 = vor.u32 %v3026_v53, %v2514_v54  ;;  %v3114_v54 = vld [vmem:[%s4707_s1 + $0x654] sm:$0xf] }
  0xa5   :  { %1821 = vmatpush.bf16.msrb.mxu1 %v2629_v62  ;;  %1772 = vmatmul.bf16.vlgmr.msra.gmra.mxu2 %v3684_v1  ;;  %v3030_v1 = vld [vmem:[%s4707_s1 + $0x3b4] sm:$0xf]  ;;  %v2594_v62 = vld [vmem:[%s4707_s1 + $0x438] sm:$0xf0] }
  0xa6   :  { %1840 = vmatpush.bf16.msrb.mxu2 %v2693_v58  ;;  %1791 = vmatmul.bf16.vlgmr.msra.gmra.mxu3 %v3695_v5  ;;  %v2530_v5 = vld [vmem:[%s4707_s1 + $0x3b8] sm:$0xf0]  ;;  %v3046_v58 = vld [vmem:[%s4707_s1 + $0x434] sm:$0xf] }
  0xa7   :  { %1859 = vmatpush.bf16.msrb.mxu3 %v2757_v63  ;;  %v3078_v63 = vld [vmem:[%s4707_s1 + $0x534] sm:$0xf]  ;;  %v2533_v12 = vor.u32 %v3030_v1, %v2530_v5  ;;  %v2709_v1 = vor.u32 %v3074_v42, %v2706_v43  ;;  %v3024_v5 = vld [vmem:[%s4707_s1 + $0x384] sm:$0xf] }
  0xa8   :  { %1803 = vmatpush.bf16.msrb.mxu0 %v2557_v16  ;;  %v1469_v49 = vpop.f32.mrf.mxu2  ;;  %v1433_v61 = vpop.f32.mrf.mxu0  ;;  %v2650_v16 = vld [vmem:[%s4707_s1 + $0x4a8] sm:$0xf0] }
  0xa9   :  { %1822 = vmatpush.bf16.msrb.mxu1 %v2621_v17  ;;  %v1470_v59 = vadd.f32 %v1469_v49, %v1451_v33  ;;  %v1488_v60 = vpop.f32.mrf.mxu3  ;;  %v1452_v3 = vpop.f32.mrf.mxu1  ;;  %v2597_v17 = vor.u32 %v3046_v58, %v2594_v62  ;;  %v3056_v49 = vld [vmem:[%s4707_s1 + $0x484] sm:$0xf]  ;;  %v2506_v58 = vld [vmem:[%s4707_s1 + $0x388] sm:$0xf0] }
  0xaa   :  { %1841 = vmatpush.bf16.msrb.mxu2 %v2685_v15  ;;  %v1453_v11 = vadd.f32 %v1452_v3, %v1433_v61  ;;  %v3060_v15 = vld [vmem:[%s4707_s1 + $0x4a4] sm:$0xf]  ;;  %v2698_v62 = vld [vmem:[%s4707_s1 + $0x508] sm:$0xf0]  ;;  %v3118_v3 = vld [vmem:[%s4707_s1 + $0x674] sm:$0xf] }
  0xab   :  { %1860 = vmatpush.bf16.msrb.mxu3 %v2749_v18  ;;  %v4481_v10 = vadd.f32 %v1488_v60, %v1470_v59  ;;  %v2725_v18 = vor.u32 %v3078_v63, %v2722_v2  ;;  %v2653_v30 = vor.u32 %v3060_v15, %v2650_v16  ;;  %v3040_v59 = vld [vmem:[%s4707_s1 + $0x404] sm:$0xf]  ;;  %v2570_v60 = vld [vmem:[%s4707_s1 + $0x408] sm:$0xf0]  ;;  %v2509_v2 = vor.u32 %v3024_v5, %v2506_v58 }
  0xac   :  { %1804 = vmatpush.bf16.msrb.mxu0 %v2549_v35  ;;  %v2717_v35 = vor.u32 %v3076_v26, %v2714_v27  ;;  %v3072_v61 = vld [vmem:[%s4707_s1 + $0x504] sm:$0xf] }
  0xad   :  { %1823 = vmatpush.bf16.msrb.mxu1 %v2613_v36  ;;  %v3042_v36 = vld [vmem:[%s4707_s1 + $0x414] sm:$0xf]  ;;  %v3116_v27 = vld [vmem:[%s4707_s1 + $0x664] sm:$0xf] }
  0xae   :  { %1842 = vmatpush.bf16.msrb.mxu2 %v2677_v34  ;;  %v2589_v34 = vor.u32 %v3044_v22, %v2586_v25  ;;  %v2810_v22 = vld [vmem:[%s4707_s1 + $0x5e8] sm:$0xf0] }
  0xaf   :  { %1861 = vmatpush.bf16.msrb.mxu3 %v2741_v37 }
  0xb0   :  { %1805 = vmatpush.bf16.msrb.mxu0 %v2541_v0  ;;  %v1471_v33 = vpop.f32.mrf.mxu2  ;;  %v1436_v44 = vpop.f32.mrf.mxu0 }
  0xb1   :  { %1824 = vmatpush.bf16.msrb.mxu1 %v2605_v52  ;;  %v1472_v37 = vadd.f32 %v1471_v33, %v1453_v11  ;;  %v1490_v38 = vpop.f32.mrf.mxu3  ;;  %v1455_v47 = vpop.f32.mrf.mxu1  ;;  %v2634_v52 = vld [vmem:[%s4707_s1 + $0x488] sm:$0xf0]  ;;  %v2701_v11 = vor.u32 %v3072_v61, %v2698_v62  ;;  %v3098_v33 = vld [vmem:[%s4707_s1 + $0x5d4] sm:$0xf] }
  0xb2   :  { %1843 = vmatpush.bf16.msrb.mxu2 %v2669_v57  ;;  %v2645_v57 = vor.u32 %v3058_v48, %v2642_v32  ;;  %v1456_v50 = vadd.f32 %v1455_v47, %v1436_v44  ;;  %v2637_v63 = vor.u32 %v3056_v49, %v2634_v52  ;;  %v3096_v47 = vld [vmem:[%s4707_s1 + $0x5c4] sm:$0xf]  ;;  %v2786_v52 = vld [vmem:[%s4707_s1 + $0x5b8] sm:$0xf0] }
  0xb3   :  { %1862 = vmatpush.bf16.msrb.mxu3 %v2733_v55  ;;  %v4531_v0 = vadd.f32 %v1490_v38, %v1472_v37  ;;  %v2581_v55 = vor.u32 %v3042_v36, %v2578_v41  ;;  %1739 = vmatmul.bf16.gmra.mxu0 %v3547_v56  ;;  %v3102_v56 = vld [vmem:[%s4707_s1 + $0x5f4] sm:$0xf]  ;;  %v2866_v36 = vld [vmem:[%s4707_s1 + $0x658] sm:$0xf0] }
  0xb4   :  { %1806 = vmatpush.bf16.msrb.mxu0 %v2533_v12  ;;  %1758 = vmatmul.bf16.gmra.mxu1 %v3814_v8  ;;  %v2818_v8 = vld [vmem:[%s4707_s1 + $0x5f8] sm:$0xf0]  ;;  %v2869_v43 = vor.u32 %v3114_v54, %v2866_v36 }
  0xb5   :  { %1825 = vmatpush.bf16.msrb.mxu1 %v2597_v17  ;;  %1777 = vmatmul.bf16.gmra.mxu2 %v3816_v9  ;;  %v2882_v9 = vld [vmem:[%s4707_s1 + $0x678] sm:$0xf0]  ;;  %v2821_v17 = vor.u32 %v3102_v56, %v2818_v8  ;;  %v3092_v8 = vld [vmem:[%s4707_s1 + $0x5a4] sm:$0xf] }
  0xb6   :  { %1844 = vmatpush.bf16.msrb.mxu2 %v2661_v4  ;;  %1796 = vmatmul.bf16.gmra.mxu3 %v3827_v13  ;;  %v2573_v4 = vor.u32 %v3040_v59, %v2570_v60  ;;  %v2885_v19 = vor.u32 %v3118_v3, %v2882_v9  ;;  %v2842_v3 = vld [vmem:[%s4707_s1 + $0x628] sm:$0xf0] }
  0xb7   :  { %1863 = vmatpush.bf16.msrb.mxu3 %v2725_v18 }
  0xb8   :  { %1807 = vmatpush.bf16.msrb.mxu0 %v2525_v31  ;;  %v1474_v13 = vpop.f32.mrf.mxu2  ;;  %v1438_v16 = vpop.f32.mrf.mxu0  ;;  %v2813_v31 = vor.u32 %v3100_v21, %v2810_v22 }
  0xb9   :  { %1826 = vmatpush.bf16.msrb.mxu1 %v2589_v34  ;;  %v1475_v12 = vadd.f32 %v1474_v13, %v1456_v50  ;;  %v1493_v15 = vpop.f32.mrf.mxu3  ;;  %v1457_v18 = vpop.f32.mrf.mxu1  ;;  %v2802_v34 = vld [vmem:[%s4707_s1 + $0x5d8] sm:$0xf0] }
  0xba   :  { %1845 = vmatpush.bf16.msrb.mxu2 %v2653_v30  ;;  %v1458_v26 = vadd.f32 %v1457_v18, %v1438_v16  ;;  %v2874_v30 = vld [vmem:[%s4707_s1 + $0x668] sm:$0xf0]  ;;  %v2805_v42 = vor.u32 %v3098_v33, %v2802_v34  ;;  %v3106_v16 = vld [vmem:[%s4707_s1 + $0x614] sm:$0xf] }
  0xbb   :  { %1864 = vmatpush.bf16.msrb.mxu3 %v2717_v35  ;;  %v4579_v25 = vadd.f32 %v1493_v15, %v1475_v12  ;;  %v2877_v48 = vor.u32 %v3116_v27, %v2874_v30  ;;  %v2826_v33 = vld [vmem:[%s4707_s1 + $0x608] sm:$0xf0] }
  0xbc   :  { %1808 = vmatpush.bf16.msrb.mxu0 %v2517_v51  ;;  %v3112_v51 = vld [vmem:[%s4707_s1 + $0x644] sm:$0xf] }
  0xbd   :  { %1827 = vmatpush.bf16.msrb.mxu1 %v2581_v55 }
  0xbe   :  { %1846 = vmatpush.bf16.msrb.mxu2 %v2645_v57  ;;  %v2794_v57 = vld [vmem:[%s4707_s1 + $0x5c8] sm:$0xf0] }
  0xbf   :  { %1865 = vmatpush.bf16.msrb.mxu3 %v2709_v1  ;;  %v2797_v49 = vor.u32 %v3096_v47, %v2794_v57 }
  0xc0   :  { %1809 = vmatpush.bf16.msrb.mxu0 %v2509_v2  ;;  %v1476_v32 = vpop.f32.mrf.mxu2  ;;  %v1507_v37 = vpop.f32.mrf.mxu0 }
  0xc1   :  { %1828 = vmatpush.bf16.msrb.mxu1 %v2573_v4  ;;  %v1477_v35 = vadd.f32 %v1476_v32, %v1458_v26  ;;  %v1495_v53 = vpop.f32.mrf.mxu3  ;;  %v1526_v38 = vpop.f32.mrf.mxu1  ;;  %v1508_v41 = vadd.f32 %v1507_v37, %v4481_v10  ;;  %v2858_v10 = vld [vmem:[%s4707_s1 + $0x648] sm:$0xf0]  ;;  %v3090_v4 = vld [vmem:[%s4707_s1 + $0x594] sm:$0xf] }
  0xc2   :  { %1847 = vmatpush.bf16.msrb.mxu2 %v2637_v63  ;;  %v2778_v63 = vld [vmem:[%s4707_s1 + $0x5a8] sm:$0xf0] }
  0xc3   :  { %1866 = vmatpush.bf16.msrb.mxu3 %v2701_v11  ;;  %v4599_v44 = vadd.f32 %v1495_v53, %v1477_v35  ;;  %v1527_v50 = vadd.f32 %v1526_v38, %v1508_v41  ;;  %1810 = vmatmul.bf16.vlgmr.msrb.gmra.mxu0 %v3697_v6  ;;  %v2861_v6 = vor.u32 %v3112_v51, %v2858_v10  ;;  %v2770_v11 = vld [vmem:[%s4707_s1 + $0x598] sm:$0xf0] }
  0xc4   :  { %1878 = vmatpush.bf16.msra.mxu0 %v2821_v17  ;;  %1829 = vmatmul.bf16.vlgmr.msrb.gmra.mxu1 %v3952_v23  ;;  %v3094_v23 = vld [vmem:[%s4707_s1 + $0x5b4] sm:$0xf]  ;;  %v2781_v9 = vor.u32 %v3092_v8, %v2778_v63  ;;  %v2773_v26 = vor.u32 %v3090_v4, %v2770_v11 }
  0xc5   :  { %1897 = vmatpush.bf16.msra.mxu1 %v2885_v19  ;;  %1848 = vmatmul.bf16.vlgmr.msrb.gmra.mxu2 %v3954_v24  ;;  %v3110_v24 = vld [vmem:[%s4707_s1 + $0x634] sm:$0xf]  ;;  %v2789_v61 = vor.u32 %v3094_v23, %v2786_v52 }
  0xc6   :  { %3120 = vmatpush.bf16.msra.mxu2 %v2821_v17  ;;  %1867 = vmatmul.bf16.vlgmr.msrb.gmra.mxu3 %v3965_v28  ;;  %v2850_v28 = vld [vmem:[%s4707_s1 + $0x638] sm:$0xf0] }
  0xc7   :  { %3128 = vmatpush.bf16.msra.mxu3 %v2885_v19  ;;  %v2853_v56 = vor.u32 %v3110_v24, %v2850_v28  ;;  %v2834_v17 = vld [vmem:[%s4707_s1 + $0x618] sm:$0xf0] }
  0xc8   :  { %1879 = vmatpush.bf16.msra.mxu0 %v2813_v31  ;;  %v1545_v55 = vpop.f32.mrf.mxu2  ;;  %v1509_v58 = vpop.f32.mrf.mxu0  ;;  %v2837_v30 = vor.u32 %v3106_v16, %v2834_v17 }
  0xc9   :  { %1898 = vmatpush.bf16.msra.mxu1 %v2877_v48  ;;  %v1564_v1 = vpop.f32.mrf.mxu3  ;;  %v1546_v5 = vadd.f32 %v1545_v55, %v1527_v50  ;;  %v1528_v59 = vpop.f32.mrf.mxu1  ;;  %v1510_v60 = vadd.f32 %v1509_v58, %v4531_v0  ;;  %v3108_v0 = vld [vmem:[%s4707_s1 + $0x624] sm:$0xf] }
  0xca   :  { %3121 = vmatpush.bf16.msra.mxu2 %v2813_v31  ;;  %v2845_v13 = vor.u32 %v3108_v0, %v2842_v3  ;;  %v3088_v31 = vld [vmem:[%s4707_s1 + $0x584] sm:$0xf] }
  0xcb   :  { %3129 = vmatpush.bf16.msra.mxu3 %v2877_v48  ;;  %v4631_v62 = vadd.f32 %v1564_v1, %v1546_v5  ;;  %v1529_v2 = vadd.f32 %v1528_v59, %v1510_v60  ;;  %v2762_v48 = vld [vmem:[%s4707_s1 + $0x588] sm:$0xf0] }
  0xcc   :  { %1880 = vmatpush.bf16.msra.mxu0 %v2805_v42  ;;  %v2765_v34 = vor.u32 %v3088_v31, %v2762_v48 }
  0xcd   :  { %1899 = vmatpush.bf16.msra.mxu1 %v2869_v43 }
  0xce   :  { %3122 = vmatpush.bf16.msra.mxu2 %v2805_v42 }
  0xcf   :  { %3130 = vmatpush.bf16.msra.mxu3 %v2869_v43 }
  0xd0   :  { %1881 = vmatpush.bf16.msra.mxu0 %v2797_v49  ;;  %v1547_v12 = vpop.f32.mrf.mxu2  ;;  %v1512_v19 = vpop.f32.mrf.mxu0 }
  0xd1   :  { %1900 = vmatpush.bf16.msra.mxu1 %v2861_v6  ;;  %v1566_v15 = vpop.f32.mrf.mxu3  ;;  %v1548_v18 = vadd.f32 %v1547_v12, %v1529_v2  ;;  %v1531_v21 = vpop.f32.mrf.mxu1  ;;  %v1513_v22 = vadd.f32 %v1512_v19, %v4579_v25  ;;  %v3104_v25 = vld [vmem:[%s4707_s1 + $0x604] sm:$0xf] }
  0xd2   :  { %3123 = vmatpush.bf16.msra.mxu2 %v2797_v49 }
  0xd3   :  { %3131 = vmatpush.bf16.msra.mxu3 %v2861_v6  ;;  %v1567_v27 = vadd.f32 %v1566_v15, %v1548_v18  ;;  %v1532_v32 = vadd.f32 %v1531_v21, %v1513_v22  ;;  %1815 = vmatmul.bf16.gmra.mxu0 %v3829_v14  ;;  %v2829_v14 = vor.u32 %v3104_v25, %v2826_v33 }
  0xd4   :  { %1882 = vmatpush.bf16.msra.mxu0 %v2789_v61  ;;  %1834 = vmatmul.bf16.gmra.mxu1 %v4084_v39 }
  0xd5   :  { %1901 = vmatpush.bf16.msra.mxu1 %v2853_v56  ;;  %1853 = vmatmul.bf16.gmra.mxu2 %v4086_v40 }
  0xd6   :  { %3124 = vmatpush.bf16.msra.mxu2 %v2789_v61  ;;  %1872 = vmatmul.bf16.gmra.mxu3 %v4097_v45 }
  0xd7   :  { %3132 = vmatpush.bf16.msra.mxu3 %v2853_v56 }
  0xd8   :  { %1883 = vmatpush.bf16.msra.mxu0 %v2781_v9  ;;  %v1550_v35 = vpop.f32.mrf.mxu2  ;;  %v1514_v54 = vpop.f32.mrf.mxu0 }
  0xd9   :  { %1902 = vmatpush.bf16.msra.mxu1 %v2845_v13  ;;  %v1569_v39 = vpop.f32.mrf.mxu3  ;;  %v1551_v53 = vadd.f32 %v1550_v35, %v1532_v32  ;;  %v1533_v36 = vpop.f32.mrf.mxu1  ;;  %v1515_v37 = vadd.f32 %v1514_v54, %v4599_v44 }
  0xda   :  { %3125 = vmatpush.bf16.msra.mxu2 %v2781_v9 }
  0xdb   :  { %3133 = vmatpush.bf16.msra.mxu3 %v2845_v13  ;;  %v1570_v38 = vadd.f32 %v1569_v39, %v1551_v53  ;;  %v1534_v40 = vadd.f32 %v1533_v36, %v1515_v37 }
  0xdc   :  { %1884 = vmatpush.bf16.msra.mxu0 %v2773_v26 }
  0xdd   :  { %1903 = vmatpush.bf16.msra.mxu1 %v2837_v30 }
  0xde   :  { %3126 = vmatpush.bf16.msra.mxu2 %v2773_v26 }
  0xdf   :  { %3134 = vmatpush.bf16.msra.mxu3 %v2837_v30 }
  0xe0   :  { %1885 = vmatpush.bf16.msra.mxu0 %v2765_v34  ;;  %v1552_v45 = vpop.f32.mrf.mxu2  ;;  %v1583_v43 = vpop.f32.mrf.mxu0 }
  0xe1   :  { %1904 = vmatpush.bf16.msra.mxu1 %v2829_v14  ;;  %v1571_v41 = vpop.f32.mrf.mxu3  ;;  %v1553_v42 = vadd.f32 %v1552_v45, %v1534_v40  ;;  %v1602_v47 = vpop.f32.mrf.mxu1  ;;  %v1584_v57 = vadd.f32 %v1583_v43, %v4631_v62 }
  0xe2   :  { %3127 = vmatpush.bf16.msra.mxu2 %v2765_v34 }
  0xe3   :  { %3135 = vmatpush.bf16.msra.mxu3 %v2829_v14  ;;  %v1572_v50 = vadd.f32 %v1571_v41, %v1553_v42  ;;  %v1603_v51 = vadd.f32 %v1602_v47, %v1584_v57  ;;  %1886 = vmatmul.bf16.vlgmr.msra.gmra.mxu0 %v3967_v29 }
  0xe4   :  { %1905 = vmatmul.bf16.vlgmr.msra.gmra.mxu1 %v4210_v7 }
  0xe5   :  { %1891 = vmatmul.bf16.vlgmr.msra.gmra.mxu2 %v4099_v46 }
  0xe6   :  { %1910 = vmatmul.bf16.vlgmr.msra.gmra.mxu3 %v4318_v20 }
  0xe8   :  { %v1621_v44 = vpop.f32.mrf.mxu2  ;;  %v1585_v6 = vpop.f32.mrf.mxu0 }
  0xe9   :  { %v1640_v10 = vpop.f32.mrf.mxu3  ;;  %v1622_v49 = vadd.f32 %v1621_v44, %v1603_v51  ;;  %v1604_v23 = vpop.f32.mrf.mxu1  ;;  %v1586_v52 = vadd.f32 %v1585_v6, %v1567_v27 }
  0xeb   :  { %v1641_v55 = vadd.f32 %v1640_v10, %v1622_v49  ;;  %v1605_v1 = vadd.f32 %v1604_v23, %v1586_v52 }
  0xf0   :  { %v1623_v24 = vpop.f32.mrf.mxu2  ;;  %v1588_v58 = vpop.f32.mrf.mxu0 }
  0xf1   :  { %v1642_v28 = vpop.f32.mrf.mxu3  ;;  %v1624_v5 = vadd.f32 %v1623_v24, %v1605_v1  ;;  %v1607_v59 = vpop.f32.mrf.mxu1  ;;  %v1589_v29 = vadd.f32 %v1588_v58, %v1570_v38 }
  0xf3   :  { %v1643_v60 = vadd.f32 %v1642_v28, %v1624_v5  ;;  %v1608_v7 = vadd.f32 %v1607_v59, %v1589_v29 }
  0xf8   :  { %v1626_v61 = vpop.f32.mrf.mxu2  ;;  %v1590_v20 = vpop.f32.mrf.mxu0 }
  0xf9   :  { %v1645_v46 = vpop.f32.mrf.mxu3  ;;  %v1627_v62 = vadd.f32 %v1626_v61, %v1608_v7  ;;  %v1609_v56 = vpop.f32.mrf.mxu1  ;;  %v1591_v8 = vadd.f32 %v1590_v20, %v1572_v50 }
  0xfb   :  { %v1646_v63 = vadd.f32 %v1645_v46, %v1627_v62  ;;  %v1610_v2 = vadd.f32 %v1609_v56, %v1591_v8 }
 0x100   :  { %v1628_v0 = vpop.f32.mrf.mxu2  ;;  %v1659_v13 = vpop.f32.mrf.mxu0 }
 0x101   :  { %v1647_v3 = vpop.f32.mrf.mxu3  ;;  %v1629_v9 = vadd.f32 %v1628_v0, %v1610_v2  ;;  %v1678_v4 = vpop.f32.mrf.mxu1  ;;  %v4680_v11 = vadd.f32 %v1659_v13, %v1641_v55 }
 0x103   :  { %v1648_v12 = vadd.f32 %v1647_v3, %v1629_v9 }
 0x108   :  { %v1697_v15 = vpop.f32.mrf.mxu2  ;;  %v1661_v18 = vpop.f32.mrf.mxu0 }
 0x109   :  { %v1716_v16 = vpop.f32.mrf.mxu3  ;;  %v1698_v17 = vadd.f32 %v1697_v15, %v1678_v4  ;;  %v1680_v19 = vpop.f32.mrf.mxu1  ;;  %v4682_v21 = vadd.f32 %v1661_v18, %v1643_v60 }
 0x10b   :  { %v1717_v22 = vadd.f32 %v1716_v16, %v1698_v17 }
 0x110   :  { %v1699_v26 = vpop.f32.mrf.mxu2  ;;  %v1664_v31 = vpop.f32.mrf.mxu0 }
 0x111   :  { %v1718_v27 = vpop.f32.mrf.mxu3  ;;  %v1700_v30 = vadd.f32 %v1699_v26, %v1680_v19  ;;  %v1683_v48 = vpop.f32.mrf.mxu1  ;;  %v4684_v32 = vadd.f32 %v1664_v31, %v1646_v63 }
 0x113   :  { %v1719_v25 = vadd.f32 %v1718_v27, %v1700_v30 }
 0x118   :  { %v1702_v33 = vpop.f32.mrf.mxu2  ;;  %v1666_v35 = vpop.f32.mrf.mxu0 }
 0x119   :  { %v1721_v34 = vpop.f32.mrf.mxu3  ;;  %v1703_v14 = vadd.f32 %v1702_v33, %v1683_v48  ;;  %v1685_v39 = vpop.f32.mrf.mxu1  ;;  %v4686_v53 = vadd.f32 %v1666_v35, %v1648_v12 }
 0x11b   :  { %v1722_v54 = vadd.f32 %v1721_v34, %v1703_v14 }
 0x120   :  { %v1704_v36 = vpop.f32.mrf.mxu2  ;;  %v1735_v38 = vpop.f32.mrf.mxu0 }
 0x121   :  { %v1723_v37 = vpop.f32.mrf.mxu3  ;;  %v1754_v40 = vpop.f32.mrf.mxu1  ;;  %v1736_v59 = vadd.f32 %v1735_v38, %v1717_v22  ;;  %v1705_v62 = vadd.f32 %v1704_v36, %v1685_v39 }
 0x123   :  { %v1755_v20 = vadd.f32 %v1754_v40, %v1736_v59  ;;  %v1724_v63 = vadd.f32 %v1723_v37, %v1705_v62 }
 0x128   :  { %v1773_v45 = vpop.f32.mrf.mxu2  ;;  %v1737_v42 = vpop.f32.mrf.mxu0 }
 0x129   :  { %v1792_v41 = vpop.f32.mrf.mxu3  ;;  %v1756_v43 = vpop.f32.mrf.mxu1  ;;  %v1738_v46 = vadd.f32 %v1737_v42, %v1719_v25  ;;  %v1774_v56 = vadd.f32 %v1773_v45, %v1755_v20 }
 0x12b   :  { %v1757_v8 = vadd.f32 %v1756_v43, %v1738_v46  ;;  %v1793_v15 = vadd.f32 %v1792_v41, %v1774_v56 }
 0x130   :  { %v1775_v47 = vpop.f32.mrf.mxu2  ;;  %v1740_v50 = vpop.f32.mrf.mxu0 }
 0x131   :  { %v1794_v57 = vpop.f32.mrf.mxu3  ;;  %v1759_v51 = vpop.f32.mrf.mxu1  ;;  %v1741_v2 = vadd.f32 %v1740_v50, %v1722_v54  ;;  %v1776_v0 = vadd.f32 %v1775_v47, %v1757_v8 }
 0x133   :  { %v1760_v16 = vadd.f32 %v1759_v51, %v1741_v2  ;;  %v1795_v17 = vadd.f32 %v1794_v57, %v1776_v0 }
 0x138   :  { %v1778_v44 = vpop.f32.mrf.mxu2  ;;  %v1742_v49 = vpop.f32.mrf.mxu0 }
 0x139   :  { %v1797_v10 = vpop.f32.mrf.mxu3  ;;  %v1761_v6 = vpop.f32.mrf.mxu1  ;;  %v1743_v13 = vadd.f32 %v1742_v49, %v1724_v63  ;;  %v1779_v19 = vadd.f32 %v1778_v44, %v1760_v16  ;;  %v3136_v63 = vld [vmem:[%s4709_s2] ss:$0 sm:$0xff] }
 0x13b   :  { %v1762_v22 = vadd.f32 %v1761_v6, %v1743_v13  ;;  %v1798_v25 = vadd.f32 %v1797_v10, %v1779_v19 }
 0x140   :  { %v1780_v23 = vpop.f32.mrf.mxu2  ;;  %v1811_v55 = vpop.f32.mrf.mxu0 }
 0x141   :  { %v1799_v52 = vpop.f32.mrf.mxu3  ;;  %v1830_v1 = vpop.f32.mrf.mxu1  ;;  %v1812_v18 = vadd.f32 %v1811_v55, %v1793_v15  ;;  %v1781_v27 = vadd.f32 %v1780_v23, %v1762_v22 }
 0x143   :  { %v1831_v30 = vadd.f32 %v1830_v1, %v1812_v18  ;;  %v1800_v39 = vadd.f32 %v1799_v52, %v1781_v27 }
 0x148   :  { %v1849_v24 = vpop.f32.mrf.mxu2  ;;  %v1813_v5 = vpop.f32.mrf.mxu0 }
 0x149   :  { %v1868_v28 = vpop.f32.mrf.mxu3  ;;  %v1832_v58 = vpop.f32.mrf.mxu1  ;;  %v1814_v26 = vadd.f32 %v1813_v5, %v1795_v17  ;;  %v1850_v14 = vadd.f32 %v1849_v24, %v1831_v30 }
 0x14b   :  { %v1833_v35 = vadd.f32 %v1832_v58, %v1814_v26  ;;  %v1869_v38 = vadd.f32 %v1868_v28, %v1850_v14 }
 0x150   :  { %v1851_v29 = vpop.f32.mrf.mxu2  ;;  %v1816_v7 = vpop.f32.mrf.mxu0 }
 0x151   :  { %v1870_v60 = vpop.f32.mrf.mxu3  ;;  %v1835_v61 = vpop.f32.mrf.mxu1  ;;  %v1817_v54 = vadd.f32 %v1816_v7, %v1798_v25  ;;  %v1852_v36 = vadd.f32 %v1851_v29, %v1833_v35 }
 0x153   :  { %v1836_v40 = vadd.f32 %v1835_v61, %v1817_v54  ;;  %v1871_v45 = vadd.f32 %v1870_v60, %v1852_v36 }
 0x158   :  { %v1854_v3 = vpop.f32.mrf.mxu2  ;;  %v1818_v4 = vpop.f32.mrf.mxu0 }
 0x159   :  { %v1873_v9 = vpop.f32.mrf.mxu3  ;;  %v1837_v12 = vpop.f32.mrf.mxu1  ;;  %v1819_v37 = vadd.f32 %v1818_v4, %v1800_v39  ;;  %v1855_v47 = vadd.f32 %v1854_v3, %v1836_v40 }
 0x15b   :  { %v1838_v57 = vadd.f32 %v1837_v12, %v1819_v37  ;;  %v1874_v23 = vadd.f32 %v1873_v9, %v1855_v47 }
 0x160   :  { %v1856_v31 = vpop.f32.mrf.mxu2  ;;  %v1887_v33 = vpop.f32.mrf.mxu0 }
 0x161   :  { %v1875_v48 = vpop.f32.mrf.mxu3  ;;  %v1906_v34 = vpop.f32.mrf.mxu1  ;;  %v1888_v41 = vadd.f32 %v1887_v33, %v1869_v38  ;;  %v1857_v44 = vadd.f32 %v1856_v31, %v1838_v57 }
 0x163   :  { %v1907_v49 = vadd.f32 %v1906_v34, %v1888_v41  ;;  %v1876_v52 = vadd.f32 %v1875_v48, %v1857_v44 }
 0x168   :  { %v1892_v42 = vpop.f32.mrf.mxu2  ;;  %v1889_v50 = vpop.f32.mrf.mxu0 }
 0x169   :  { %v1911_v43 = vpop.f32.mrf.mxu3  ;;  %v1890_v51 = vadd.f32 %v1889_v50, %v1871_v45  ;;  %v1908_v10 = vpop.f32.mrf.mxu1  ;;  %v1893_v1 = vadd.f32 %v1892_v42, %v1874_v23 }
 0x16b   :  { %v1909_v6 = vadd.f32 %v1908_v10, %v1890_v51  ;;  %v1912_v29 = vadd.f32 %v1911_v43, %v1893_v1 }
 0x16d   :  { %v1916_v55 = vadd.f32 %v1909_v6, %v1907_v49 }
 0x16f   :  { %v1917_v24 = vrot.slane %v1916_v55, 4 }
 0x170   :  { %v1894_v5 = vpop.f32.mrf.mxu2 }
 0x171   :  { %v1895_v28 = vadd.f32 %v1894_v5, %v1876_v52  ;;  %v1918_v58 = vadd.f32 %v1917_v24, %v1916_v55  ;;  %v1913_v59 = vpop.f32.mrf.mxu3 }
 0x173   :  { %v1914_v60 = vadd.f32 %v1913_v59, %v1895_v28  ;;  %v1919_v7 = vrot.slane %v1918_v58, 2 }
 0x175   :  { %v1923_v61 = vadd.f32 %v1914_v60, %v1912_v29  ;;  %v1920_v46 = vadd.f32 %v1919_v7, %v1918_v58 }
 0x177   :  { %v1924_v62 = vrot.slane %v1923_v61, 4  ;;  %v1921_v20 = vrot.slane %v1920_v46, 1 }
 0x179   :  { %v1925_v56 = vadd.f32 %v1924_v62, %v1923_v61  ;;  %v1922_v8 = vadd.f32 %v1921_v20, %v1920_v46 }
 0x17b   :  { %v1926_v2 = vrot.slane %v1925_v56, 2  ;;  %v1930_v0 = vadd.f32 %v1922_v8, %v4680_v11  ;;  %v1931_v3 = vadd.f32 %v1922_v8, %v4682_v21 }
 0x17d   :  { %v1927_v9 = vadd.f32 %v1926_v2, %v1925_v56  ;;  %v1938_v13 = vadd.f32 %v3136_v63, %v1930_v0  ;;  %v1939_v4 = vadd.f32 %v3136_v63, %v1931_v3 }
 0x17f   :  { %v1928_v12 = vrot.slane %v1927_v9, 1  ;;  %1942 = vst [vmem:[%s4710_s3] sm:$0xff] %v1938_v13 }
 0x180   :  { %1943 = vst [vmem:[%s4710_s3 + $0x8] sm:$0xff] %v1939_v4 }
 0x181   :  { %v1929_v15 = vadd.f32 %v1928_v12, %v1927_v9 }
 0x183   :  { %v1932_v16 = vadd.f32 %v1929_v15, %v4684_v32  ;;  %v1933_v17 = vadd.f32 %v1929_v15, %v4686_v53 }
 0x185   :  { %v1940_v11 = vadd.f32 %v3136_v63, %v1932_v16  ;;  %v1941_v18 = vadd.f32 %v3136_v63, %v1933_v17 }
 0x187   :  { %1944 = vst [vmem:[%s4710_s3 + $0x10] sm:$0xff] %v1940_v11 }
 0x188   :  { %1945 = vst [vmem:[%s4710_s3 + $0x18] sm:$0xff] %v1941_v18 }

</bundles_post_ra>
